<compile_context>
chip_gen: v6e
topology: v6e:2x2x1
jax: 0.10.0
libtpu: 0.0.40
codegen_flags: <defaults>
</compile_context>

<pallas_src>
import functools

import jax
import jax.numpy as jnp
from jax.experimental import pallas as pl
from jax.experimental.pallas import tpu as pltpu


def _round_up(x, m):
    return (x + m - 1) // m * m


def _vmem_limit_bytes():
    # Generation-aware scoped-VMEM limit with headroom for Mosaic internal
    # scratch: v7x has 64 MiB/TC physical -> 48 MiB; v5e/v6e have 128 MiB -> 64 MiB.
    try:
        cap = int(pltpu.get_tpu_info().vmem_capacity_bytes)
    except Exception:
        cap = 128 << 20
    return int(min(64 << 20, (cap * 3) // 4))


_VMEM_LIMIT = _vmem_limit_bytes()


# ----------------------------------------------------------------------------
# Kernel 1: fused (user+item) Conv1d (same padding, odd K) + ReLU + MaxPool(L)
# Grid = (tower, review-block). K accumulated MXU matmuls per grid step.
# ----------------------------------------------------------------------------
def conv_relu_maxpool_kernel(x_ref, w_ref, b_ref, out_ref, *, L, K):
    # x_ref: (1, TB, Lp, D) compute_dtype   w_ref: (1, K, D, C_pad) compute_dtype
    # b_ref: (1, 1, C_pad) f32              out_ref: (1, TB, C_pad) f32
    TB = x_ref.shape[1]
    D = x_ref.shape[3]
    C = w_ref.shape[-1]

    x = x_ref[0]                                             # (TB, Lp, D)
    # Tap 0, then accumulate taps 1..K-1: no lane concat, only one shifted
    # slice live at a time, f32 accumulation on the MXU result.
    acc = jnp.dot(x[:, 0:L, :].reshape(TB * L, D), w_ref[0, 0],
                  preferred_element_type=jnp.float32)        # (TB*L, C_pad)
    for k in range(1, K):
        acc = acc + jnp.dot(x[:, k:k + L, :].reshape(TB * L, D), w_ref[0, k],
                            preferred_element_type=jnp.float32)
    pooled = jnp.max(acc.reshape(TB, L, C), axis=1)          # (TB, C_pad)
    # bias + ReLU after the pool: max commutes with the per-channel monotone
    # (+b, relu), so this is bit-identical and L x cheaper on the VPU.
    out_ref[0] = jnp.maximum(pooled + b_ref[0], 0.0)


def conv_relu_maxpool_fused(x, w_all, b_all, *, L, K, tb, vmem_limit):
    # x: (2, NB_pad, Lp, D) ; w_all: (2, K, D, C_pad) ; b_all: (2, 1, C_pad) f32
    T, NB_pad, Lp, D = x.shape
    C_pad = w_all.shape[-1]
    grid = (T, NB_pad // tb)
    return pl.pallas_call(
        functools.partial(conv_relu_maxpool_kernel, L=L, K=K),
        out_shape=jax.ShapeDtypeStruct((T, NB_pad, C_pad), jnp.float32),
        grid=grid,
        in_specs=[
            pl.BlockSpec((1, tb, Lp, D), lambda t, n: (t, n, 0, 0)),
            pl.BlockSpec((1, K, D, C_pad), lambda t, n: (t, 0, 0, 0)),
            pl.BlockSpec((1, 1, C_pad), lambda t, n: (t, 0, 0)),
        ],
        out_specs=pl.BlockSpec((1, tb, C_pad), lambda t, n: (t, n, 0)),
        compiler_params=pltpu.CompilerParams(
            dimension_semantics=("parallel", "parallel"),
            vmem_limit_bytes=vmem_limit,
        ),
    )(x, w_all, b_all)


# ----------------------------------------------------------------------------
# Kernel 2: CNN output Linears + Tanh, transform MLP, FactorizationMachine.
# Tiny dense head -> one fused kernel, whole arrays resident in VMEM; all
# weights already transposed / channel-padded in prepare_params.
# ----------------------------------------------------------------------------
def head_kernel(u_ref, i_ref,
                wu_ref, bu_ref, wi_ref, bi_ref,
                w1u_ref, w1i_ref, b1_ref, w2_ref, b2_ref,
                wfm_ref, bfm_ref, v_ref,
                trans_ref, pred_ref):
    f32 = jnp.float32
    # CNN final Linear + Tanh (user / item towers); padded channels hit zero
    # weight rows so the lane-dense padded input is free.
    u_lat = jnp.tanh(
        jnp.dot(u_ref[...], wu_ref[...], preferred_element_type=f32) + bu_ref[...])
    i_lat = jnp.tanh(
        jnp.dot(i_ref[...], wi_ref[...], preferred_element_type=f32) + bi_ref[...])
    # transform layer 1: Linear(concat([u, i])) as split-weight matmuls
    h1 = jnp.tanh(
        jnp.dot(u_lat, w1u_ref[...], preferred_element_type=f32)
        + jnp.dot(i_lat, w1i_ref[...], preferred_element_type=f32)
        + b1_ref[...])
    # transform layer 2 (+ Dropout -> identity in eval mode)
    h2 = jnp.tanh(
        jnp.dot(h1, w2_ref[...], preferred_element_type=f32) + b2_ref[...])
    trans_ref[...] = h2
    # Factorization machine on trans_latent (detach is a no-op for forward values)
    x = h2
    lin = jnp.dot(x, wfm_ref[...], preferred_element_type=f32) + bfm_ref[...]   # (B, 1)
    v = v_ref[...]
    ip1 = jnp.dot(x, v, preferred_element_type=f32)
    ip2 = jnp.dot(x * x, v * v, preferred_element_type=f32)
    pair = jnp.sum(ip1 * ip1 - ip2, axis=1, keepdims=True)                      # (B, 1)
    pred_ref[...] = lin + 0.5 * pair


def head(u_flat, i_flat, prep, vmem_limit):
    B = u_flat.shape[0]
    cnn_out = prep["w2T"].shape[-1]
    vmem = pl.BlockSpec(memory_space=pltpu.MemorySpace.VMEM)
    args = (u_flat, i_flat,
            prep["wuT"], prep["bu"], prep["wiT"], prep["bi"],
            prep["w1uT"], prep["w1iT"], prep["b1"], prep["w2T"], prep["b2"],
            prep["fm_wT"], prep["fm_b"], prep["fm_v"])
    trans, pred = pl.pallas_call(
        head_kernel,
        out_shape=(jax.ShapeDtypeStruct((B, cnn_out), jnp.float32),
                   jax.ShapeDtypeStruct((B, 1), jnp.float32)),
        in_specs=[vmem] * len(args),
        out_specs=(vmem, vmem),
        compiler_params=pltpu.CompilerParams(vmem_limit_bytes=vmem_limit),
    )(*args)
    return trans, pred


# ----------------------------------------------------------------------------
# One-time parameter preparation (hoisted out of the jitted forward)
# ----------------------------------------------------------------------------
def prepare_params(params, *, compute_dtype=jnp.float32):
    """Layout/dtype prep done once: transposes, channel padding, HBM-side casts."""
    emb = params["word_emb"]
    vocab, D = emb.shape
    C, _, K = params["conv_w_u"].shape                 # torch layout (C, D, K)
    RC = params["wu_lin"].shape[1] // C
    cnn_out = params["w2"].shape[0]
    C_pad = _round_up(C, 128)                          # lane-dense pooled output

    # Extra all-zero row (index == vocab) so conv "same" padding and the NB
    # round-up fold into the embedding gather; cast here so the dominant
    # activation DMA stream is already compute_dtype in HBM.
    emb_ext = jnp.concatenate(
        [emb, jnp.zeros((1, D), emb.dtype)], axis=0).astype(compute_dtype)

    def prep_conv(w, b):
        # (C, D, K) -> (K, D, C_pad): one (D, C_pad) MXU tap per k, lane-padded.
        wk = jnp.transpose(w, (2, 1, 0))
        wk = jnp.pad(wk, ((0, 0), (0, 0), (0, C_pad - C)))
        bk = jnp.pad(b.reshape(1, C), ((0, 0), (0, C_pad - C)))
        return wk.astype(compute_dtype), bk.astype(jnp.float32)

    wu, bu = prep_conv(params["conv_w_u"], params["conv_b_u"])
    wi, bi = prep_conv(params["conv_w_i"], params["conv_b_i"])

    def prep_lin(w):
        # (cnn_out, RC*C) -> (RC*C_pad, cnn_out) with zero rows for the padded
        # channels, so the head consumes pool[:, :NB].reshape(B, RC*C_pad)
        # directly (no strided :C lane slice between pallas_calls).
        w3 = w.reshape(cnn_out, RC, C)
        w3 = jnp.pad(w3, ((0, 0), (0, 0), (0, C_pad - C)))
        return jnp.transpose(w3.reshape(cnn_out, RC * C_pad))

    return {
        "emb_ext": emb_ext,                               # (vocab+1, D)
        "w_all": jnp.stack([wu, wi]),                     # (2, K, D, C_pad)
        "b_all": jnp.stack([bu, bi]),                     # (2, 1, C_pad) f32
        "wuT": prep_lin(params["wu_lin"]), "bu": params["bu_lin"],
        "wiT": prep_lin(params["wi_lin"]), "bi": params["bi_lin"],
        "w1uT": params["w1u"].T, "w1iT": params["w1i"].T, "b1": params["b1"],
        "w2T": params["w2"].T, "b2": params["b2"],
        "fm_wT": params["fm_w"].T, "fm_b": params["fm_b"], "fm_v": params["fm_v"],
    }


# ----------------------------------------------------------------------------
# Full SourceNet forward (takes prepared params)
# ----------------------------------------------------------------------------
def source_net_forward(prep, user_reviews, item_reviews, user_ids, item_ids,
                       *, tb_max=512):
    del user_ids, item_ids                      # only used when extend_model=True
    B, RC, L = user_reviews.shape
    NB = B * RC
    emb_ext = prep["emb_ext"]
    vocab_ext, D = emb_ext.shape
    pad_tok = vocab_ext - 1
    _, K, _, C_pad = prep["w_all"].shape
    pad = (K - 1) // 2
    Lp = L + 2 * pad

    x_item = jnp.dtype(emb_ext.dtype).itemsize
    w_item = jnp.dtype(prep["w_all"].dtype).itemsize
    # bf16 blocks want 16-row sublane alignment (packed sublanes), f32 wants 8.
    align = 16 if x_item < 4 else 8

    vmem_limit = _VMEM_LIMIT
    budget = (vmem_limit * 3) // 4              # per-step working-set soft budget

    def step_bytes(tb):
        x_blk = tb * Lp * D * x_item            # input block (double-buffered)
        out_blk = tb * C_pad * 4                # output block (double-buffered)
        w_blk = K * D * C_pad * w_item + C_pad * 4
        acc = tb * L * C_pad * 4                # f32 accumulator temporary
        xk = tb * L * D * x_item                # per-tap shifted slice
        return 2 * (x_blk + out_blk + w_blk) + 2 * acc + 2 * xk

    tb = max(align, min(_round_up(tb_max, align), _round_up(NB, align)))
    while tb > align and step_bytes(tb) > budget:
        tb //= 2
    tb = _round_up(tb, align)
    NB_pad = _round_up(NB, tb)

    def prep_tokens(reviews):
        tok = reviews.reshape(NB, L)
        return jnp.pad(tok, ((0, NB_pad - NB), (pad, pad)),
                       constant_values=pad_tok)

    tok_all = jnp.concatenate(
        [prep_tokens(user_reviews), prep_tokens(item_reviews)], axis=0)
    # TODO(synk): embedding gather kept in plain JAX (glue, not the hot path).
    # D (word_dim) is deliberately NOT lane-padded to 128: for small D the extra
    # zero columns would multiply the dominant HBM stream by 128/D.
    x = jnp.take(emb_ext, tok_all, axis=0).reshape(2, NB_pad, Lp, D)

    pool = conv_relu_maxpool_fused(x, prep["w_all"], prep["b_all"],
                                   L=L, K=K, tb=tb, vmem_limit=vmem_limit)
    # Contiguous prefix + reshape; padded channels are zero and the head weights
    # have matching zero rows, so no strided :C slice / extra HBM round trip.
    u_flat = pool[0, :NB].reshape(B, RC * C_pad)
    i_flat = pool[1, :NB].reshape(B, RC * C_pad)
    return head(u_flat, i_flat, prep, vmem_limit)


# ----------------------------------------------------------------------------
# Pure-JAX reference (independent path: lax.conv) for correctness check
# ----------------------------------------------------------------------------
def reference_forward(params, user_reviews, item_reviews):
    B, RC, L = user_reviews.shape
    NB = B * RC
    emb = params["word_emb"]

    def cnn_tower(tokens, w, b, lw, lb):
        vec = jnp.take(emb, tokens.reshape(NB, L), axis=0)          # (NB, L, D)
        x = jnp.transpose(vec, (0, 2, 1))                           # (NB, D, L)
        pad = (w.shape[-1] - 1) // 2
        out = jax.lax.conv_general_dilated(
            x, w, window_strides=(1,), padding=[(pad, pad)],
            dimension_numbers=("NCH", "OIH", "NCH"))                # (NB, C, L)
        out = jnp.maximum(out + b[None, :, None], 0.0)
        pooled = jnp.max(out, axis=-1)                              # (NB, C)
        flat = pooled.reshape(B, -1)
        return jnp.tanh(flat @ lw.T + lb)

    u_lat = cnn_tower(user_reviews, params["conv_w_u"], params["conv_b_u"],
                      params["wu_lin"], params["bu_lin"])
    i_lat = cnn_tower(item_reviews, params["conv_w_i"], params["conv_b_i"],
                      params["wi_lin"], params["bi_lin"])
    cat = jnp.concatenate([u_lat, i_lat], axis=1)
    w1 = jnp.concatenate([params["w1u"], params["w1i"]], axis=1)
    h1 = jnp.tanh(cat @ w1.T + params["b1"])
    h2 = jnp.tanh(h1 @ params["w2"].T + params["b2"])
    x = h2
    lin = x @ params["fm_w"].T + params["fm_b"]
    ip1 = x @ params["fm_v"]
    ip2 = (x ** 2) @ (params["fm_v"] ** 2)
    pair = jnp.sum(ip1 ** 2 - ip2, axis=1, keepdims=True)
    return h2, lin + 0.5 * pair


# ----------------------------------------------------------------------------
# Deterministic parameter init (mirrors shapes / init style of the nn.Module)
# ----------------------------------------------------------------------------
def init_params(key, *, vocab, word_dim, kernel_count, kernel_size,
                review_count, cnn_out_dim):
    ks = jax.random.split(key, 16)
    nrm = lambda k, shape, std: (std * jax.random.normal(k, shape)).astype(jnp.float32)
    w1 = jnp.clip(nrm(ks[9], (cnn_out_dim, 2 * cnn_out_dim), 0.1), -1.0, 1.0)
    params = {
        "word_emb": nrm(ks[0], (vocab, word_dim), 0.1),
        # CNN user tower
        "conv_w_u": nrm(ks[1], (kernel_count, word_dim, kernel_size), 0.05),
        "conv_b_u": nrm(ks[2], (kernel_count,), 0.05),
        "wu_lin": nrm(ks[3], (cnn_out_dim, kernel_count * review_count), 0.05),
        "bu_lin": nrm(ks[4], (1, cnn_out_dim), 0.05),
        # CNN item tower
        "conv_w_i": nrm(ks[5], (kernel_count, word_dim, kernel_size), 0.05),
        "conv_b_i": nrm(ks[6], (kernel_count,), 0.05),
        "wi_lin": nrm(ks[7], (cnn_out_dim, kernel_count * review_count), 0.05),
        "bi_lin": nrm(ks[8], (1, cnn_out_dim), 0.05),
        # transform: normal(0, 0.1).clamp(-1, 1), bias = 0.1
        "w1u": w1[:, :cnn_out_dim],
        "w1i": w1[:, cnn_out_dim:],
        "b1": jnp.full((1, cnn_out_dim), 0.1, jnp.float32),
        "w2": jnp.clip(nrm(ks[10], (cnn_out_dim, cnn_out_dim), 0.1), -1.0, 1.0),
        "b2": jnp.full((1, cnn_out_dim), 0.1, jnp.float32),
        # FactorizationMachine(in_dim=cnn_out_dim, k=8)
        "fm_v": jnp.full((cnn_out_dim, 8), 0.001, jnp.float32),
        "fm_w": nrm(ks[11], (1, cnn_out_dim), 0.001),
        "fm_b": nrm(ks[12], (1, 1), 0.01),
    }
    return params


if __name__ == "__main__":
    # Small config consistent with the module's forward.
    batch, review_count, review_length = 2, 2, 16
    vocab, word_dim = 50, 32
    kernel_count, kernel_size, cnn_out_dim = 32, 3, 32

    key = jax.random.PRNGKey(0)
    kp, ku, ki, kuid, kiid = jax.random.split(key, 5)
    params = init_params(kp, vocab=vocab, word_dim=word_dim,
                         kernel_count=kernel_count, kernel_size=kernel_size,
                         review_count=review_count, cnn_out_dim=cnn_out_dim)

    user_reviews = jax.random.randint(
        ku, (batch, review_count, review_length), 0, vocab, dtype=jnp.int32)
    item_reviews = jax.random.randint(
        ki, (batch, review_count, review_length), 0, vocab, dtype=jnp.int32)
    user_ids = jax.random.randint(kuid, (batch,), 0, 10, dtype=jnp.int32)
    item_ids = jax.random.randint(kiid, (batch,), 0, 10, dtype=jnp.int32)

    fwd = jax.jit(source_net_forward)

    # f32 path (tight check against the independent pure-JAX reference).
    prep_f32 = prepare_params(params, compute_dtype=jnp.float32)
    trans_latent, prediction = fwd(prep_f32, user_reviews, item_reviews,
                                   user_ids, item_ids)
    jax.block_until_ready((trans_latent, prediction))

    ref_trans, ref_pred = reference_forward(params, user_reviews, item_reviews)
    assert trans_latent.shape == (batch, cnn_out_dim)
    assert prediction.shape == (batch, 1)
    assert jnp.allclose(trans_latent, ref_trans, atol=1e-4, rtol=1e-4)
    assert jnp.allclose(prediction, ref_pred, atol=1e-4, rtol=1e-4)

    # bf16-operand path (f32 accumulation, cast done HBM-side) — looser tolerance.
    prep_bf16 = prepare_params(params, compute_dtype=jnp.bfloat16)
    trans_bf16, pred_bf16 = fwd(prep_bf16, user_reviews, item_reviews,
                                user_ids, item_ids)
    jax.block_until_ready((trans_bf16, pred_bf16))
    assert jnp.allclose(trans_bf16, ref_trans, atol=2e-2, rtol=2e-2)
    assert jnp.allclose(pred_bf16, ref_pred, atol=2e-2, rtol=2e-2)

    print("KERNEL_OK")
</pallas_src>

<mosaic_0001>
module attributes {stable_mosaic.version = 11 : i64} {
  func.func @head_kernel(%arg0: memref<2x256xf32, #tpu.memory_space<vmem>>, %arg1: memref<2x256xf32, #tpu.memory_space<vmem>>, %arg2: memref<256x32xf32, #tpu.memory_space<vmem>>, %arg3: memref<1x32xf32, #tpu.memory_space<vmem>>, %arg4: memref<256x32xf32, #tpu.memory_space<vmem>>, %arg5: memref<1x32xf32, #tpu.memory_space<vmem>>, %arg6: memref<32x32xf32, #tpu.memory_space<vmem>>, %arg7: memref<32x32xf32, #tpu.memory_space<vmem>>, %arg8: memref<1x32xf32, #tpu.memory_space<vmem>>, %arg9: memref<32x32xf32, #tpu.memory_space<vmem>>, %arg10: memref<1x32xf32, #tpu.memory_space<vmem>>, %arg11: memref<32x1xf32, #tpu.memory_space<vmem>>, %arg12: memref<1x1xf32, #tpu.memory_space<vmem>>, %arg13: memref<32x8xf32, #tpu.memory_space<vmem>>, %arg14: memref<2x32xf32, #tpu.memory_space<vmem>>, %arg15: memref<2x1xf32, #tpu.memory_space<vmem>>) attributes {dimension_semantics = [], scalar_prefetch = 0 : i64, scratch_operands = 0 : i64, tpu.core_type = #tpu.core_type<tc>} {
    %c0 = arith.constant 0 : index
    %c0_0 = arith.constant 0 : index
    %0 = vector.load %arg0[%c0, %c0_0] : memref<2x256xf32, #tpu.memory_space<vmem>>, vector<2x256xf32>
    %c0_1 = arith.constant 0 : index
    %c0_2 = arith.constant 0 : index
    %1 = vector.load %arg2[%c0_1, %c0_2] : memref<256x32xf32, #tpu.memory_space<vmem>>, vector<256x32xf32>
    %cst = arith.constant dense<0.000000e+00> : vector<2x32xf32>
    %2 = tpu.matmul %0, %1, %cst {dimension_numbers = #tpu.dot_dimension_numbers<[1], [0], [0], [1], [0, 0, 1, 1], [], []>} : vector<2x256xf32>, vector<256x32xf32>, vector<2x32xf32> -> vector<2x32xf32>
    %c0_3 = arith.constant 0 : index
    %c0_4 = arith.constant 0 : index
    %3 = vector.load %arg3[%c0_3, %c0_4] : memref<1x32xf32, #tpu.memory_space<vmem>>, vector<1x32xf32>
    %4 = vector.broadcast %3 : vector<1x32xf32> to vector<2x32xf32>
    %5 = arith.addf %2, %4 : vector<2x32xf32>
    %6 = math.tanh %5 : vector<2x32xf32>
    %c0_5 = arith.constant 0 : index
    %c0_6 = arith.constant 0 : index
    %7 = vector.load %arg1[%c0_5, %c0_6] : memref<2x256xf32, #tpu.memory_space<vmem>>, vector<2x256xf32>
    %c0_7 = arith.constant 0 : index
    %c0_8 = arith.constant 0 : index
    %8 = vector.load %arg4[%c0_7, %c0_8] : memref<256x32xf32, #tpu.memory_space<vmem>>, vector<256x32xf32>
    %cst_9 = arith.constant dense<0.000000e+00> : vector<2x32xf32>
    %9 = tpu.matmul %7, %8, %cst_9 {dimension_numbers = #tpu.dot_dimension_numbers<[1], [0], [0], [1], [0, 0, 1, 1], [], []>} : vector<2x256xf32>, vector<256x32xf32>, vector<2x32xf32> -> vector<2x32xf32>
    %c0_10 = arith.constant 0 : index
    %c0_11 = arith.constant 0 : index
    %10 = vector.load %arg5[%c0_10, %c0_11] : memref<1x32xf32, #tpu.memory_space<vmem>>, vector<1x32xf32>
    %11 = vector.broadcast %10 : vector<1x32xf32> to vector<2x32xf32>
    %12 = arith.addf %9, %11 : vector<2x32xf32>
    %13 = math.tanh %12 : vector<2x32xf32>
    %c0_12 = arith.constant 0 : index
    %c0_13 = arith.constant 0 : index
    %14 = vector.load %arg6[%c0_12, %c0_13] : memref<32x32xf32, #tpu.memory_space<vmem>>, vector<32x32xf32>
    %cst_14 = arith.constant dense<0.000000e+00> : vector<2x32xf32>
    %15 = tpu.matmul %6, %14, %cst_14 {dimension_numbers = #tpu.dot_dimension_numbers<[1], [0], [0], [1], [0, 0, 1, 1], [], []>} : vector<2x32xf32>, vector<32x32xf32>, vector<2x32xf32> -> vector<2x32xf32>
    %c0_15 = arith.constant 0 : index
    %c0_16 = arith.constant 0 : index
    %16 = vector.load %arg7[%c0_15, %c0_16] : memref<32x32xf32, #tpu.memory_space<vmem>>, vector<32x32xf32>
    %cst_17 = arith.constant dense<0.000000e+00> : vector<2x32xf32>
    %17 = tpu.matmul %13, %16, %cst_17 {dimension_numbers = #tpu.dot_dimension_numbers<[1], [0], [0], [1], [0, 0, 1, 1], [], []>} : vector<2x32xf32>, vector<32x32xf32>, vector<2x32xf32> -> vector<2x32xf32>
    %18 = arith.addf %15, %17 : vector<2x32xf32>
    %c0_18 = arith.constant 0 : index
    %c0_19 = arith.constant 0 : index
    %19 = vector.load %arg8[%c0_18, %c0_19] : memref<1x32xf32, #tpu.memory_space<vmem>>, vector<1x32xf32>
    %20 = vector.broadcast %19 : vector<1x32xf32> to vector<2x32xf32>
    %21 = arith.addf %18, %20 : vector<2x32xf32>
    %22 = math.tanh %21 : vector<2x32xf32>
    %c0_20 = arith.constant 0 : index
    %c0_21 = arith.constant 0 : index
    %23 = vector.load %arg9[%c0_20, %c0_21] : memref<32x32xf32, #tpu.memory_space<vmem>>, vector<32x32xf32>
    %cst_22 = arith.constant dense<0.000000e+00> : vector<2x32xf32>
    %24 = tpu.matmul %22, %23, %cst_22 {dimension_numbers = #tpu.dot_dimension_numbers<[1], [0], [0], [1], [0, 0, 1, 1], [], []>} : vector<2x32xf32>, vector<32x32xf32>, vector<2x32xf32> -> vector<2x32xf32>
    %c0_23 = arith.constant 0 : index
    %c0_24 = arith.constant 0 : index
    %25 = vector.load %arg10[%c0_23, %c0_24] : memref<1x32xf32, #tpu.memory_space<vmem>>, vector<1x32xf32>
    %26 = vector.broadcast %25 : vector<1x32xf32> to vector<2x32xf32>
    %27 = arith.addf %24, %26 : vector<2x32xf32>
    %28 = math.tanh %27 : vector<2x32xf32>
    %c0_25 = arith.constant 0 : index
    %c0_26 = arith.constant 0 : index
    %29 = vector.load %arg14[%c0_25, %c0_26] : memref<2x32xf32, #tpu.memory_space<vmem>>, vector<2x32xf32>
    tpu.vector_store %arg14[%c0_25, %c0_26], %28 {strides = array<i32>} : memref<2x32xf32, #tpu.memory_space<vmem>>, vector<2x32xf32>,
    %c0_27 = arith.constant 0 : index
    %c0_28 = arith.constant 0 : index
    %30 = vector.load %arg11[%c0_27, %c0_28] : memref<32x1xf32, #tpu.memory_space<vmem>>, vector<32x1xf32>
    %cst_29 = arith.constant dense<0.000000e+00> : vector<2x1xf32>
    %31 = tpu.matmul %28, %30, %cst_29 {dimension_numbers = #tpu.dot_dimension_numbers<[1], [0], [0], [1], [0, 0, 1, 1], [], []>} : vector<2x32xf32>, vector<32x1xf32>, vector<2x1xf32> -> vector<2x1xf32>
    %c0_30 = arith.constant 0 : index
    %c0_31 = arith.constant 0 : index
    %32 = vector.load %arg12[%c0_30, %c0_31] : memref<1x1xf32, #tpu.memory_space<vmem>>, vector<1x1xf32>
    %33 = vector.broadcast %32 : vector<1x1xf32> to vector<2x1xf32>
    %34 = arith.addf %31, %33 : vector<2x1xf32>
    %c0_32 = arith.constant 0 : index
    %c0_33 = arith.constant 0 : index
    %35 = vector.load %arg13[%c0_32, %c0_33] : memref<32x8xf32, #tpu.memory_space<vmem>>, vector<32x8xf32>
    %cst_34 = arith.constant dense<0.000000e+00> : vector<2x8xf32>
    %36 = tpu.matmul %28, %35, %cst_34 {dimension_numbers = #tpu.dot_dimension_numbers<[1], [0], [0], [1], [0, 0, 1, 1], [], []>} : vector<2x32xf32>, vector<32x8xf32>, vector<2x8xf32> -> vector<2x8xf32>
    %37 = arith.mulf %28, %28 : vector<2x32xf32>
    %38 = arith.mulf %35, %35 : vector<32x8xf32>
    %cst_35 = arith.constant dense<0.000000e+00> : vector<2x8xf32>
    %39 = tpu.matmul %37, %38, %cst_35 {dimension_numbers = #tpu.dot_dimension_numbers<[1], [0], [0], [1], [0, 0, 1, 1], [], []>} : vector<2x32xf32>, vector<32x8xf32>, vector<2x8xf32> -> vector<2x8xf32>
    %40 = arith.mulf %36, %36 : vector<2x8xf32>
    %41 = arith.subf %40, %39 : vector<2x8xf32>
    %cst_36 = arith.constant dense<0.000000e+00> : vector<2xf32>
    %42 = vector.multi_reduction <add>, %41, %cst_36 [1] : vector<2x8xf32> to vector<2xf32>
    %43 = vector.shape_cast %42 : vector<2xf32> to vector<2x1xf32>
    %cst_37 = arith.constant 5.000000e-01 : f32
    %44 = vector.broadcast %cst_37 : f32 to vector<2x1xf32>
    %45 = arith.mulf %44, %43 : vector<2x1xf32>
    %46 = arith.addf %34, %45 : vector<2x1xf32>
    %c0_38 = arith.constant 0 : index
    %c0_39 = arith.constant 0 : index
    %47 = vector.load %arg15[%c0_38, %c0_39] : memref<2x1xf32, #tpu.memory_space<vmem>>, vector<2x1xf32>
    tpu.vector_store %arg15[%c0_38, %c0_39], %46 {strides = array<i32>} : memref<2x1xf32, #tpu.memory_space<vmem>>, vector<2x1xf32>,
    return
  }
}

module attributes {stable_mosaic.version = 11 : i64} {
  func.func @conv_relu_maxpool_kernel(%arg0: i32, %arg1: i32, %arg2: memref<1x8x18x32xf32, #tpu.memory_space<vmem>>, %arg3: memref<1x3x32x128xf32, #tpu.memory_space<vmem>>, %arg4: memref<1x1x128xf32, #tpu.memory_space<vmem>>, %arg5: memref<1x8x128xf32, #tpu.memory_space<vmem>>) attributes {dimension_semantics = [#tpu.dimension_semantics<parallel>, #tpu.dimension_semantics<parallel>], iteration_bounds = array<i64: 2, 1>, scalar_prefetch = 0 : i64, scratch_operands = 0 : i64, tpu.core_type = #tpu.core_type<tc>, window_params = [{transform_indices = @transform_0, window_bounds = array<i64: 1, 8, 18, 32>}, {transform_indices = @transform_1, window_bounds = array<i64: 1, 3, 32, 128>}, {transform_indices = @transform_2, window_bounds = array<i64: 1, 1, 128>}, {transform_indices = @transform_3, window_bounds = array<i64: 1, 8, 128>}]} {
    %c0 = arith.constant 0 : index
    %c0_0 = arith.constant 0 : index
    %c0_1 = arith.constant 0 : index
    %c0_2 = arith.constant 0 : index
    %0 = vector.load %arg2[%c0, %c0_0, %c0_1, %c0_2] : memref<1x8x18x32xf32, #tpu.memory_space<vmem>>, vector<1x8x18x32xf32>
    %1 = vector.shape_cast %0 : vector<1x8x18x32xf32> to vector<8x18x32xf32>
    %2 = vector.extract_strided_slice %1 {offsets = [0, 0, 0], sizes = [8, 16, 32], strides = [1, 1, 1]} : vector<8x18x32xf32> to vector<8x16x32xf32>
    %3 = vector.shape_cast %2 : vector<8x16x32xf32> to vector<128x32xf32>
    %c0_3 = arith.constant 0 : index
    %c0_4 = arith.constant 0 : index
    %c0_5 = arith.constant 0 : index
    %c0_6 = arith.constant 0 : index
    %4 = vector.load %arg3[%c0_3, %c0_4, %c0_5, %c0_6] : memref<1x3x32x128xf32, #tpu.memory_space<vmem>>, vector<1x1x32x128xf32>
    %5 = vector.shape_cast %4 : vector<1x1x32x128xf32> to vector<32x128xf32>
    %cst = arith.constant dense<0.000000e+00> : vector<128x128xf32>
    %6 = tpu.matmul %3, %5, %cst {dimension_numbers = #tpu.dot_dimension_numbers<[1], [0], [0], [1], [0, 0, 1, 1], [], []>} : vector<128x32xf32>, vector<32x128xf32>, vector<128x128xf32> -> vector<128x128xf32>
    %7 = vector.extract_strided_slice %1 {offsets = [0, 1, 0], sizes = [8, 16, 32], strides = [1, 1, 1]} : vector<8x18x32xf32> to vector<8x16x32xf32>
    %8 = vector.shape_cast %7 : vector<8x16x32xf32> to vector<128x32xf32>
    %c0_7 = arith.constant 0 : index
    %c1 = arith.constant 1 : index
    %c0_8 = arith.constant 0 : index
    %c0_9 = arith.constant 0 : index
    %9 = vector.load %arg3[%c0_7, %c1, %c0_8, %c0_9] : memref<1x3x32x128xf32, #tpu.memory_space<vmem>>, vector<1x1x32x128xf32>
    %10 = vector.shape_cast %9 : vector<1x1x32x128xf32> to vector<32x128xf32>
    %cst_10 = arith.constant dense<0.000000e+00> : vector<128x128xf32>
    %11 = tpu.matmul %8, %10, %cst_10 {dimension_numbers = #tpu.dot_dimension_numbers<[1], [0], [0], [1], [0, 0, 1, 1], [], []>} : vector<128x32xf32>, vector<32x128xf32>, vector<128x128xf32> -> vector<128x128xf32>
    %12 = arith.addf %6, %11 : vector<128x128xf32>
    %13 = vector.extract_strided_slice %1 {offsets = [0, 2, 0], sizes = [8, 16, 32], strides = [1, 1, 1]} : vector<8x18x32xf32> to vector<8x16x32xf32>
    %14 = vector.shape_cast %13 : vector<8x16x32xf32> to vector<128x32xf32>
    %c0_11 = arith.constant 0 : index
    %c2 = arith.constant 2 : index
    %c0_12 = arith.constant 0 : index
    %c0_13 = arith.constant 0 : index
    %15 = vector.load %arg3[%c0_11, %c2, %c0_12, %c0_13] : memref<1x3x32x128xf32, #tpu.memory_space<vmem>>, vector<1x1x32x128xf32>
    %16 = vector.shape_cast %15 : vector<1x1x32x128xf32> to vector<32x128xf32>
    %cst_14 = arith.constant dense<0.000000e+00> : vector<128x128xf32>
    %17 = tpu.matmul %14, %16, %cst_14 {dimension_numbers = #tpu.dot_dimension_numbers<[1], [0], [0], [1], [0, 0, 1, 1], [], []>} : vector<128x32xf32>, vector<32x128xf32>, vector<128x128xf32> -> vector<128x128xf32>
    %18 = arith.addf %12, %17 : vector<128x128xf32>
    %19 = vector.shape_cast %18 : vector<128x128xf32> to vector<8x16x128xf32>
    %cst_15 = arith.constant dense<0xFF800000> : vector<8x128xf32>
    %20 = vector.multi_reduction <maximumf>, %19, %cst_15 [1] : vector<8x16x128xf32> to vector<8x128xf32>
    %c0_16 = arith.constant 0 : index
    %c0_17 = arith.constant 0 : index
    %c0_18 = arith.constant 0 : index
    %21 = vector.load %arg4[%c0_16, %c0_17, %c0_18] : memref<1x1x128xf32, #tpu.memory_space<vmem>>, vector<1x1x128xf32>
    %22 = vector.shape_cast %21 : vector<1x1x128xf32> to vector<1x128xf32>
    %23 = vector.broadcast %22 : vector<1x128xf32> to vector<8x128xf32>
    %24 = arith.addf %20, %23 : vector<8x128xf32>
    %cst_19 = arith.constant 0.000000e+00 : f32
    %25 = vector.broadcast %cst_19 : f32 to vector<8x128xf32>
    %26 = arith.maximumf %24, %25 : vector<8x128xf32>
    %c0_20 = arith.constant 0 : index
    %c0_21 = arith.constant 0 : index
    %c0_22 = arith.constant 0 : index
    %27 = vector.load %arg5[%c0_20, %c0_21, %c0_22] : memref<1x8x128xf32, #tpu.memory_space<vmem>>, vector<1x8x128xf32>
    %28 = vector.shape_cast %27 : vector<1x8x128xf32> to vector<8x128xf32>
    %29 = vector.shape_cast %26 : vector<8x128xf32> to vector<1x8x128xf32>
    tpu.vector_store %arg5[%c0_20, %c0_21, %c0_22], %29 {strides = array<i32>} : memref<1x8x128xf32, #tpu.memory_space<vmem>>, vector<1x8x128xf32>,
    return
  }
  func.func @transform_0(%arg0: i32, %arg1: i32) -> (i32, i32, i32, i32) {
    %c0_i32 = arith.constant 0 : i32
    %c0_i32_0 = arith.constant 0 : i32
    %c0_i32_1 = arith.constant 0 : i32
    return %arg0, %arg1, %c0_i32, %c0_i32_0 : i32, i32, i32, i32
  }
  func.func @transform_1(%arg0: i32, %arg1: i32) -> (i32, i32, i32, i32) {
    %c0_i32 = arith.constant 0 : i32
    %c0_i32_0 = arith.constant 0 : i32
    %c0_i32_1 = arith.constant 0 : i32
    %c0_i32_2 = arith.constant 0 : i32
    return %arg0, %c0_i32, %c0_i32_0, %c0_i32_1 : i32, i32, i32, i32
  }
  func.func @transform_2(%arg0: i32, %arg1: i32) -> (i32, i32, i32) {
    %c0_i32 = arith.constant 0 : i32
    %c0_i32_0 = arith.constant 0 : i32
    %c0_i32_1 = arith.constant 0 : i32
    return %arg0, %c0_i32, %c0_i32_0 : i32, i32, i32
  }
  func.func @transform_3(%arg0: i32, %arg1: i32) -> (i32, i32, i32) {
    %c0_i32 = arith.constant 0 : i32
    %c0_i32_0 = arith.constant 0 : i32
    return %arg0, %arg1, %c0_i32 : i32, i32, i32
  }
}

</mosaic_0001>

<bundles_post_ra>
// kernel: squeeze.2
= control target key start
LH: loop header
LB: loop body
LE: loop exit
PB: predicated region body
PF: predicated region fallthrough
CT: control target
= control target key end

     0   :  { %s45_s0 = inlined_call_operand.vmem [shape: f32[1,4,128], index: 0, kind: input, shape index: {}]   ;;  %s46_s1 = inlined_call_operand.vmem [shape: f32[2,256], index: 1, kind: output, shape index: {}]  }
   0x1   :  { %v5_v0 = vld [vmem:[%s45_s0] sm:$0xf] }
   0x2   :  { %6 = vst [vmem:[#allocation1] sm:$0xf] %v5_v0 }
   0x9   :  { %v7_v1 = vld [vmem:[#allocation1] sm:$0xf]  }
   0xa   :  { %8 = vst [vmem:[#allocation0] ss:$8 sm:$0x3] %v7_v1   ;;  %10 = vst [vmem:[#allocation0 - $0xf] ss:$8 sm:$0xc] %v7_v1  }
  0x11   :  { %v15_v2 = vld [vmem:[#allocation0] sm:$0x3]  ;;  %v20_v3 = vld [vmem:[#allocation0 + $0x8] sm:$0x3] }
  0x12   :  { %18 = vst [vmem:[%s46_s1] sm:$0x3] %v15_v2  ;;  %25 = vst [vmem:[%s46_s1 + $0x2] sm:$0x3] %v20_v3 }

// kernel: source_net_forward.3
= control target key start
LH: loop header
LB: loop body
LE: loop exit
PB: predicated region body
PF: predicated region fallthrough
CT: control target
= control target key end

     0   :  { %s1427_s0 = inlined_call_operand.vmem [shape: f32[2,256], index: 0, kind: input, shape index: {}]   ;;  %s1428_s1 = inlined_call_operand.vmem [shape: f32[2,256], index: 1, kind: input, shape index: {}]   ;;  %s1429_s2 = inlined_call_operand.vmem [shape: f32[256,32], index: 2, kind: input, shape index: {}]   ;;  %s1430_s3 = inlined_call_operand.vmem [shape: f32[1,32], index: 3, kind: input, shape index: {}]   ;;  %s1431_s4 = inlined_call_operand.vmem [shape: f32[256,32], index: 4, kind: input, shape index: {}]   ;;  %s1432_s5 = inlined_call_operand.vmem [shape: f32[1,32], index: 5, kind: input, shape index: {}]   ;;  %s1433_s6 = inlined_call_operand.vmem [shape: f32[32,32], index: 6, kind: input, shape index: {}]   ;;  %s1434_s7 = inlined_call_operand.vmem [shape: f32[32,32], index: 7, kind: input, shape index: {}]   ;;  %s1435_s8 = inlined_call_operand.vmem [shape: f32[1,32], index: 8, kind: input, shape index: {}]   ;;  %s1436_s9 = inlined_call_operand.vmem [shape: f32[32,32], index: 9, kind: input, shape index: {}]   ;;  %s1437_s10 = inlined_call_operand.vmem [shape: f32[1,32], index: 10, kind: input, shape index: {}]   ;;  %s1438_s11 = inlined_call_operand.vmem [shape: f32[32,1], index: 11, kind: input, shape index: {}]   ;;  %s1439_s12 = inlined_call_operand.<no memory space> [shape: f32[1,1], index: 12, kind: input, shape index: {}]   ;;  %s1440_s13 = inlined_call_operand.vmem [shape: f32[32,8], index: 13, kind: input, shape index: {}]   ;;  %s1441_s14 = inlined_call_operand.hbm [shape: f32[2,32], index: 14, kind: output, shape index: {0}]   ;;  %s1442_s15 = inlined_call_operand.vmem [shape: f32[2,1], index: 15, kind: output, shape index: {1}]  }
   0x1   :  { %v21_v0 = vstv %s1439_s12 }
   0x2   :  { %22 = vst [vmem:[#allocation2] sm:$0x1] %v21_v0 }
   0x3   :  { %v84_v1 = vld [vmem:[%s1429_s2 + $0xf8] sm:$0xff]  ;;  %v83_v5 = vld [vmem:[%s1429_s2 + $0xf0] sm:$0xff]  ;;  %v82_v9 = vld [vmem:[%s1429_s2 + $0xe8] sm:$0xff] }
   0x4   :  { %v206_v2 = vld [vmem:[%s1431_s4 + $0xf8] sm:$0xff]  ;;  %824 = vmatprep.subr.mxu0 %v84_v1  ;;  %v205_v6 = vld [vmem:[%s1431_s4 + $0xf0] sm:$0xff]  ;;  %v204_v10 = vld [vmem:[%s1431_s4 + $0xe8] sm:$0xff] }
   0x5   :  { %v68_v3 = vld [vmem:[%s1429_s2 + $0x78] sm:$0xff]  ;;  %859 = vmatprep.subr.mxu1 %v206_v2  ;;  %v67_v7 = vld [vmem:[%s1429_s2 + $0x70] sm:$0xff]  ;;  %v66_v11 = vld [vmem:[%s1429_s2 + $0x68] sm:$0xff] }
   0x6   :  { %v190_v4 = vld [vmem:[%s1431_s4 + $0x78] sm:$0xff]  ;;  %825 = vmatpush3.msra.mxu0 %v68_v3  ;;  %v189_v8 = vld [vmem:[%s1431_s4 + $0x70] sm:$0xff]  ;;  %v188_v12 = vld [vmem:[%s1431_s4 + $0x68] sm:$0xff] }
   0x7   :  { %860 = vmatpush3.msra.mxu1 %v190_v4  ;;  %826 = vmatprep.subr.mxu0 %v83_v5  ;;  %v81_v13 = vld [vmem:[%s1429_s2 + $0xe0] sm:$0xff]  ;;  %v80_v17 = vld [vmem:[%s1429_s2 + $0xd8] sm:$0xff]  ;;  %v79_v21 = vld [vmem:[%s1429_s2 + $0xd0] sm:$0xff] }
   0x8   :  { %861 = vmatprep.subr.mxu1 %v205_v6  ;;  %827 = vmatpush3.msra.mxu0 %v67_v7  ;;  %v203_v14 = vld [vmem:[%s1431_s4 + $0xe0] sm:$0xff]  ;;  %v202_v18 = vld [vmem:[%s1431_s4 + $0xd8] sm:$0xff]  ;;  %v201_v22 = vld [vmem:[%s1431_s4 + $0xd0] sm:$0xff] }
   0x9   :  { %862 = vmatpush3.msra.mxu1 %v189_v8  ;;  %828 = vmatprep.subr.mxu0 %v82_v9  ;;  %v65_v15 = vld [vmem:[%s1429_s2 + $0x60] sm:$0xff]  ;;  %v64_v19 = vld [vmem:[%s1429_s2 + $0x58] sm:$0xff]  ;;  %v63_v23 = vld [vmem:[%s1429_s2 + $0x50] sm:$0xff] }
   0xa   :  { %863 = vmatprep.subr.mxu1 %v204_v10  ;;  %v187_v16 = vld [vmem:[%s1431_s4 + $0x60] sm:$0xff]  ;;  %829 = vmatpush3.msra.mxu0 %v66_v11  ;;  %v186_v20 = vld [vmem:[%s1431_s4 + $0x58] sm:$0xff]  ;;  %v185_v24 = vld [vmem:[%s1431_s4 + $0x50] sm:$0xff] }
   0xb   :  { %864 = vmatpush3.msra.mxu1 %v188_v12  ;;  %830 = vmatprep.subr.mxu0 %v81_v13  ;;  %v78_v25 = vld [vmem:[%s1429_s2 + $0xc8] sm:$0xff]  ;;  %v77_v29 = vld [vmem:[%s1429_s2 + $0xc0] sm:$0xff]  ;;  %v76_v33 = vld [vmem:[%s1429_s2 + $0xb8] sm:$0xff] }
   0xc   :  { %865 = vmatprep.subr.mxu1 %v203_v14  ;;  %831 = vmatpush3.msra.mxu0 %v65_v15  ;;  %v200_v26 = vld [vmem:[%s1431_s4 + $0xc8] sm:$0xff]  ;;  %v199_v30 = vld [vmem:[%s1431_s4 + $0xc0] sm:$0xff]  ;;  %v198_v34 = vld [vmem:[%s1431_s4 + $0xb8] sm:$0xff] }
   0xd   :  { %866 = vmatpush3.msra.mxu1 %v187_v16  ;;  %832 = vmatprep.subr.mxu0 %v80_v17  ;;  %v62_v27 = vld [vmem:[%s1429_s2 + $0x48] sm:$0xff]  ;;  %v61_v31 = vld [vmem:[%s1429_s2 + $0x40] sm:$0xff]  ;;  %v60_v35 = vld [vmem:[%s1429_s2 + $0x38] sm:$0xff] }
   0xe   :  { %867 = vmatprep.subr.mxu1 %v202_v18  ;;  %833 = vmatpush3.msra.mxu0 %v64_v19  ;;  %v184_v28 = vld [vmem:[%s1431_s4 + $0x48] sm:$0xff]  ;;  %v183_v32 = vld [vmem:[%s1431_s4 + $0x40] sm:$0xff]  ;;  %v182_v36 = vld [vmem:[%s1431_s4 + $0x38] sm:$0xff] }
   0xf   :  { %868 = vmatpush3.msra.mxu1 %v186_v20  ;;  %834 = vmatprep.subr.mxu0 %v79_v21  ;;  %v75_v37 = vld [vmem:[%s1429_s2 + $0xb0] sm:$0xff]  ;;  %v74_v41 = vld [vmem:[%s1429_s2 + $0xa8] sm:$0xff]  ;;  %v73_v45 = vld [vmem:[%s1429_s2 + $0xa0] sm:$0xff] }
  0x10   :  { %869 = vmatprep.subr.mxu1 %v201_v22  ;;  %835 = vmatpush3.msra.mxu0 %v63_v23  ;;  %v197_v38 = vld [vmem:[%s1431_s4 + $0xb0] sm:$0xff]  ;;  %v196_v42 = vld [vmem:[%s1431_s4 + $0xa8] sm:$0xff]  ;;  %v195_v46 = vld [vmem:[%s1431_s4 + $0xa0] sm:$0xff] }
  0x11   :  { %870 = vmatpush3.msra.mxu1 %v185_v24  ;;  %836 = vmatprep.subr.mxu0 %v78_v25  ;;  %v59_v39 = vld [vmem:[%s1429_s2 + $0x30] sm:$0xff]  ;;  %v58_v43 = vld [vmem:[%s1429_s2 + $0x28] sm:$0xff]  ;;  %v57_v47 = vld [vmem:[%s1429_s2 + $0x20] sm:$0xff] }
  0x12   :  { %871 = vmatprep.subr.mxu1 %v200_v26  ;;  %837 = vmatpush3.msra.mxu0 %v62_v27  ;;  %v181_v40 = vld [vmem:[%s1431_s4 + $0x30] sm:$0xff]  ;;  %v180_v44 = vld [vmem:[%s1431_s4 + $0x28] sm:$0xff]  ;;  %v179_v48 = vld [vmem:[%s1431_s4 + $0x20] sm:$0xff] }
  0x13   :  { %872 = vmatpush3.msra.mxu1 %v184_v28  ;;  %838 = vmatprep.subr.mxu0 %v77_v29  ;;  %v72_v49 = vld [vmem:[%s1429_s2 + $0x98] sm:$0xff] }
  0x14   :  { %873 = vmatprep.subr.mxu1 %v199_v30  ;;  %839 = vmatpush3.msra.mxu0 %v61_v31  ;;  %v194_v50 = vld [vmem:[%s1431_s4 + $0x98] sm:$0xff] }
  0x15   :  { %874 = vmatpush3.msra.mxu1 %v183_v32  ;;  %840 = vmatprep.subr.mxu0 %v76_v33 }
  0x16   :  { %875 = vmatprep.subr.mxu1 %v198_v34  ;;  %841 = vmatpush3.msra.mxu0 %v60_v35 }
  0x17   :  { %876 = vmatpush3.msra.mxu1 %v182_v36  ;;  %842 = vmatprep.subr.mxu0 %v75_v37 }
  0x18   :  { %877 = vmatprep.subr.mxu1 %v197_v38  ;;  %843 = vmatpush3.msra.mxu0 %v59_v39 }
  0x19   :  { %878 = vmatpush3.msra.mxu1 %v181_v40  ;;  %844 = vmatprep.subr.mxu0 %v74_v41 }
  0x1a   :  { %879 = vmatprep.subr.mxu1 %v196_v42  ;;  %845 = vmatpush3.msra.mxu0 %v58_v43 }
  0x1b   :  { %880 = vmatpush3.msra.mxu1 %v180_v44 }
  0x1c   :  { %23 = vsyncpa [#allocation4], 0  ;;  %846 = vmatprep.subr.mxu0 %v73_v45  ;;  %881 = vmatprep.subr.mxu1 %v195_v46  ;;  %v56_v51 = vld [vmem:[%s1429_s2 + $0x18] sm:$0xff]  ;;  %v71_v53 = vld [vmem:[%s1429_s2 + $0x90] sm:$0xff]  ;;  %v1023_v7 = vmov 0.0   ;;  %vm1024_vm0 = vmmov 0  }
  0x1d   :  { %v178_v52 = vld [vmem:[%s1431_s4 + $0x18] sm:$0xff]  ;;  %847 = vmatpush3.msra.mxu0 %v57_v47  ;;  %882 = vmatpush3.msra.mxu1 %v179_v48  ;;  %v193_v54 = vld [vmem:[%s1431_s4 + $0x90] sm:$0xff]  ;;  %v812_v57 = vld.sshfl [vmem:[%s1427_s0] sm:$0x33 pattern:$0x76325410] }
  0x1e   :  { %848 = vmatprep.subr.mxu0 %v72_v49  ;;  %883 = vmatprep.subr.mxu1 %v194_v50  ;;  %v55_v55 = vld [vmem:[%s1429_s2 + $0x10] sm:$0xff]  ;;  %v70_v58 = vld [vmem:[%s1429_s2 + $0x88] sm:$0xff]  ;;  %v814_v60 = vld.sshfl [vmem:[%s1428_s1] sm:$0x33 pattern:$0x76325410]  ;;  %v100_v1 = vcombine.high %v812_v57, %v812_v57 }
  0x1f   :  { %v177_v56 = vld [vmem:[%s1431_s4 + $0x10] sm:$0xff]  ;;  %849 = vmatpush3.msra.mxu0 %v56_v51  ;;  %884 = vmatpush3.msra.mxu1 %v178_v52  ;;  %v192_v59 = vld [vmem:[%s1431_s4 + $0x88] sm:$0xff]  ;;  %v69_v63 = vld [vmem:[%s1429_s2 + $0x80] sm:$0xff]  ;;  %v222_v3 = vcombine.high %v814_v60, %v814_v60  ;;  %vm304_vm1 = vcmask 261120   ;;  %vm545_vm2 = vcmask 254976   ;;  %vm785_vm3 = vcmask 58368  }
  0x20   :  { %850 = vmatprep.subr.mxu0 %v71_v53  ;;  %885 = vmatprep.subr.mxu1 %v193_v54  ;;  %v54_v61 = vld [vmem:[%s1429_s2 + $0x8] sm:$0xff]  ;;  %v191_v0 = vld [vmem:[%s1431_s4 + $0x80] sm:$0xff]  ;;  %v303_v5 = vld [vmem:[%s1434_s7 + $0x18] sm:$0xff] }
  0x21   :  { %v176_v62 = vld [vmem:[%s1431_s4 + $0x8] sm:$0xff]  ;;  %851 = vmatpush3.msra.mxu0 %v55_v55  ;;  %886 = vmatpush3.msra.mxu1 %v177_v56  ;;  %v53_v2 = vld [vmem:[%s1429_s2] sm:$0xff]  ;;  %v299_v6 = vld [vmem:[%s1433_s6 + $0x18] sm:$0xff] }
  0x22   :  { %852 = vmatprep.subr.mxu0 %v70_v58  ;;  %887 = vmatprep.subr.mxu1 %v192_v59  ;;  %v175_v4 = vld [vmem:[%s1431_s4] sm:$0xff]  ;;  %v302_v8 = vld [vmem:[%s1434_s7 + $0x10] sm:$0xff]  ;;  %v301_v10 = vld [vmem:[%s1434_s7 + $0x8] sm:$0xff] }
  0x23   :  { %853 = vmatpush3.msra.mxu0 %v54_v61  ;;  %888 = vmatpush3.msra.mxu1 %v176_v62  ;;  %v298_v9 = vld [vmem:[%s1433_s6 + $0x10] sm:$0xff]  ;;  %v297_v11 = vld [vmem:[%s1433_s6 + $0x8] sm:$0xff]  ;;  %v300_v12 = vld [vmem:[%s1434_s7] sm:$0xff] }
  0x24   :  { %854 = vmatprep.subr.mxu0 %v69_v63  ;;  %889 = vmatprep.subr.mxu1 %v191_v0  ;;  %v296_v13 = vld [vmem:[%s1433_s6] sm:$0xff]  ;;  %v463_v26 = vld [vmem:[%s1436_s9 + $0x18] sm:$0xff]  ;;  %v462_v27 = vld [vmem:[%s1436_s9 + $0x10] sm:$0xff] }
  0x25   :  { %855 = vmatpush3.msra.mxu0 %v53_v2  ;;  %167 = vmatprep.mubr.f32.mxu0 %v100_v1  ;;  %v811_v16 = vld [vmem:[%s1430_s3] ss:$0 sm:$0xff]  ;;  %v461_v28 = vld [vmem:[%s1436_s9 + $0x8] sm:$0xff]  ;;  %v550_v38 = vld [vmem:[%s1438_s11 + $0x18] sm:$0xff] }
  0x26   :  { %890 = vmatpush3.msra.mxu1 %v175_v4  ;;  %289 = vmatprep.mubr.f32.mxu1 %v222_v3  ;;  %v813_v18 = vld [vmem:[%s1432_s5] ss:$0 sm:$0xff]  ;;  %v634_v39 = vld [vmem:[%s1440_s13 + $0x18] sm:$0xff]  ;;  %v549_v40 = vld [vmem:[%s1438_s11 + $0x10] sm:$0xff] }
  0x27   :  { %168 = vmatmul.mubr.f32.vlgmr.msra.gmra.mxu0 %v812_v57  ;;  %290 = vmatmul.mubr.f32.vlgmr.msra.gmra.mxu1 %v814_v60  ;;  %v460_v29 = vld [vmem:[%s1436_s9] sm:$0xff]  ;;  %v633_v41 = vld [vmem:[%s1440_s13 + $0x10] sm:$0xff]  ;;  %v548_v42 = vld [vmem:[%s1438_s11 + $0x8] sm:$0xff]  ;;  %v709_v50 = vmul.f32 %v634_v39, %v634_v39 }
  0x28   :  { %924 = vmatprep.subr.mxu0 %v1023_v7  ;;  %935 = vmatprep.subr.mxu1 %v1023_v7  ;;  %v817_v32 = vld [vmem:[%s1435_s8] ss:$0 sm:$0xff]  ;;  %v632_v43 = vld [vmem:[%s1440_s13 + $0x8] sm:$0xff]  ;;  %v708_v52 = vmul.f32 %v633_v41, %v633_v41 }
  0x29   :  { %925 = vmatpush3.msra.mxu0 %v303_v5  ;;  %936 = vmatpush3.msra.mxu1 %v299_v6  ;;  %v547_v44 = vld [vmem:[%s1438_s11] sm:$0xff]  ;;  %v707_v53 = vmul.f32 %v632_v43, %v632_v43 }
  0x2a   :  { %926 = vmatprep.subr.mxu0 %v1023_v7  ;;  %937 = vmatprep.subr.mxu1 %v1023_v7  ;;  %v631_v45 = vld [vmem:[%s1440_s13] sm:$0xff] }
  0x2b   :  { %927 = vmatpush3.msra.mxu0 %v302_v8  ;;  %938 = vmatpush3.msra.mxu1 %v298_v9  ;;  %v818_v46 = vld [vmem:[%s1437_s10] ss:$0 sm:$0xff]  ;;  %v706_v54 = vmul.f32 %v631_v45, %v631_v45  ;;  %s1025_s10 = smov [#allocation3]  }
  0x2c   :  { %928 = vmatprep.subr.mxu0 %v1023_v7  ;;  %939 = vmatprep.subr.mxu1 %v1023_v7  ;;  %s799_s11 = sshll.u32 %s1025_s10, 4  ;;  %s800_s11 = int_to_ptr.vmem [resolvable:$true] %s799_s11 }
  0x2d   :  { %929 = vmatpush3.msra.mxu0 %v301_v10  ;;  %940 = vmatpush3.msra.mxu1 %v297_v11  ;;  %s1001_s13 = scalar_lea.vmem %s800_s11, 32  ;;  %p1006_p1 = scmp.lt.s32.totalorder %s800_s11, %s800_s11 }
  0x2e   :  { %930 = vmatprep.subr.mxu0 %v1023_v7  ;;  %941 = vmatprep.subr.mxu1 %v1023_v7  ;;  %p1002_p0 = scmp.ne.s32.totalorder %s800_s11, %s1001_s13  ;;  %p1007_p2 = scmp.lt.s32.totalorder %s1001_s13, %s1001_s13 }
  0x2f   :  { %931 = vmatpush3.msra.mxu0 %v300_v12  ;;  %932 = vmatprep.mubr.msk.f32.mxu0 %vm1024_vm0, %v1023_v7 }
  0x30   :  { %942 = vmatpush3.msra.mxu1 %v296_v13  ;;  %943 = vmatprep.mubr.msk.f32.mxu1 %vm1024_vm0, %v1023_v7  ;;  %p1008_p3 = por %p1007_p2, %p1006_p1 }
  0x31   :  { %946 = vmatprep.subr.mxu0 %v1023_v7  ;;  %957 = vmatprep.subr.mxu1 %v1023_v7 }
  0x32   :  { %p1009_p4 = pnand %p1008_p3, %p1002_p0 }
  0xe7   :  { %v856_v14 = vpop.f32.mrf.mxu0  ;;  %v891_v15 = vpop.f32.mrf.mxu1 }
  0xe9   :  { %v857_v17 = vpop.f32.mrf.mxu0  ;;  %v892_v19 = vpop.f32.mrf.mxu1 }
  0xea   :  { %v858_v20 = vadd.f32 %v857_v17, %v856_v14  ;;  %v893_v21 = vadd.f32 %v892_v19, %v891_v15 }
  0xec   :  { %v170_v22 = vadd.f32 %v858_v20, %v811_v16  ;;  %v292_v23 = vadd.f32 %v893_v21, %v813_v18 }
  0xee   :  { %993 = vtanh.f32 %v170_v22 }
  0xef   :  { %995 = vtanh.f32 %v292_v23 }
  0xfb   :  { %v994_v24 = vpop.eup %993 }
  0xfc   :  { %v996_v25 = vpop.eup %995  ;;  %944 = vmatmul.mubr.msk.f32.vlgmr.msra.gmra.mxu1 %vm304_vm1, %v994_v24 }
  0xfd   :  { %933 = vmatmul.mubr.msk.f32.vlgmr.msra.gmra.mxu0 %vm304_vm1, %v996_v25  ;;  %965 = vmatprep.mubr.msk.f32.mxu1 %vm1024_vm0, %v1023_v7 }
  0xfe   :  { %954 = vmatprep.mubr.msk.f32.mxu0 %vm1024_vm0, %v1023_v7  ;;  %947 = vmatpush3.msra.mxu0 %v463_v26 }
  0xff   :  { %948 = vmatprep.subr.mxu0 %v1023_v7  ;;  %958 = vmatpush3.msra.mxu1 %v550_v38 }
 0x100   :  { %949 = vmatpush3.msra.mxu0 %v462_v27  ;;  %959 = vmatprep.subr.mxu1 %v1023_v7 }
 0x101   :  { %950 = vmatprep.subr.mxu0 %v1023_v7  ;;  %960 = vmatpush3.msra.mxu1 %v549_v40 }
 0x102   :  { %951 = vmatpush3.msra.mxu0 %v461_v28  ;;  %961 = vmatprep.subr.mxu1 %v1023_v7 }
 0x103   :  { %952 = vmatprep.subr.mxu0 %v1023_v7  ;;  %962 = vmatpush3.msra.mxu1 %v548_v42 }
 0x104   :  { %953 = vmatpush3.msra.mxu0 %v460_v29  ;;  %963 = vmatprep.subr.mxu1 %v1023_v7 }
 0x105   :  { %968 = vmatprep.subr.mxu0 %v1023_v7  ;;  %964 = vmatpush3.msra.mxu1 %v547_v44 }
 0x106   :  { %979 = vmatprep.subr.mxu1 %v1023_v7 }
 0x1bc   :  { %v447_v30 = vpop.f32.mrf.mxu1 }
 0x1bd   :  { %v374_v31 = vpop.f32.mrf.mxu0 }
 0x1be   :  { %v448_v33 = vadd.f32 %v447_v30, %v374_v31  ;;  %v945_v34 = vpop.f32.mrf.mxu1 }
 0x1bf   :  { %v934_v35 = vpop.f32.mrf.mxu0 }
 0x1c0   :  { %v458_v36 = vadd.f32 %v817_v32, %v448_v33 }
 0x1c2   :  { %997 = vtanh.f32 %v458_v36 }
 0x1cf   :  { %v998_v37 = vpop.eup %997 }
 0x1d0   :  { %955 = vmatmul.mubr.msk.f32.vlgmr.msra.gmra.mxu0 %vm304_vm1, %v998_v37 }
 0x1d1   :  { %976 = vmatprep.mubr.msk.f32.mxu0 %vm1024_vm0, %v1023_v7  ;;  %969 = vmatpush3.msra.mxu0 %v634_v39 }
 0x1d2   :  { %970 = vmatprep.subr.mxu0 %v1023_v7 }
 0x1d3   :  { %971 = vmatpush3.msra.mxu0 %v633_v41 }
 0x1d4   :  { %972 = vmatprep.subr.mxu0 %v1023_v7 }
 0x1d5   :  { %973 = vmatpush3.msra.mxu0 %v632_v43 }
 0x1d6   :  { %974 = vmatprep.subr.mxu0 %v1023_v7 }
 0x1d7   :  { %975 = vmatpush3.msra.mxu0 %v631_v45 }
 0x290   :  { %v540_v47 = vpop.f32.mrf.mxu0 }
 0x291   :  { %v541_v48 = vadd.f32 %v818_v46, %v540_v47 }
 0x292   :  { %v956_v49 = vpop.f32.mrf.mxu0 }
 0x293   :  { %999 = vtanh.f32 %v541_v48 }
 0x2a0   :  { %v1000_v51 = vpop.eup %999 }
 0x2a1   :  { %966 = vmatmul.mubr.msk.f32.vlgmr.msra.gmra.mxu1 %vm304_vm1, %v1000_v51  ;;  %977 = vmatmul.mubr.msk.f32.vlgmr.msra.gmra.mxu0 %vm304_vm1, %v1000_v51  ;;  %546 = vst.msk [vmem:[#allocation3] sm:$0x3] %vm545_vm2, %v1000_v51  ;;  %v705_v55 = vmul.f32 %v1000_v51, %v1000_v51 }
 0x2a2   :  { %980 = vmatpush3.msra.mxu1 %v709_v50  ;;  %987 = vmatprep.mubr.msk.f32.mxu1 %vm1024_vm0, %v1023_v7 }
 0x2a3   :  { %981 = vmatprep.subr.mxu1 %v1023_v7 }
 0x2a4   :  { %982 = vmatpush3.msra.mxu1 %v708_v52 }
 0x2a5   :  { %983 = vmatprep.subr.mxu1 %v1023_v7 }
 0x2a6   :  { %984 = vmatpush3.msra.mxu1 %v707_v53 }
 0x2a7   :  { %985 = vmatprep.subr.mxu1 %v1023_v7 }
 0x2a8   :  { %986 = vmatpush3.msra.mxu1 %v706_v54 }
 0x2a9   :  { %988 = vmatmul.mubr.msk.f32.vlgmr.msra.gmra.mxu1 %vm304_vm1, %v705_v55 }
 0x361   :  { %v627_v56 = vpop.f32.mrf.mxu1  ;;  %v701_v57 = vpop.f32.mrf.mxu0 }
 0x362   :  { %v783_v60 = vmul.f32 %v701_v57, %v701_v57 }
 0x363   :  { %v967_v58 = vpop.f32.mrf.mxu1  ;;  %v978_v59 = vpop.f32.mrf.mxu0 }
 0x369   :  { %v779_v61 = vpop.f32.mrf.mxu1 }
 0x36a   :  { %v784_v62 = vsub.f32 %v783_v60, %v779_v61 }
 0x36b   :  { %v989_v63 = vpop.f32.mrf.mxu1 }
 0x36c   :  { %v786_v0 = vsel %vm785_vm3, %v784_v62, 0.0 }
 0x36d   :  { %787 = vadd.xlane.f32.xlu0 %v786_v0 }
 0x36e   :  { %1012 = shalt.err (!%p1009_p4)
}
 0x36f   :  { %802 = dma.vmem_to_hbm [thread:$0]  %s800_s11, 32, %s1441_s14, [#allocation4]   ;;  %v820_v1 = vld [vmem:[#allocation2] ss:$0 sm:$0xff]  ;;  %vm791_vm4 = vcmask 1024  }
 0x370   :  { %v628_v3 = vadd.f32 %v820_v1, %v627_v56 }
 0x3f6   :  { %v788_v2 = vpop.xlane.xlu0 %787 }
 0x3f7   :  { %v789_v4 = vmul.f32 0.5, %v788_v2 }
 0x3f9   :  { %v790_v5 = vadd.f32 %v789_v4, %v628_v3 }
 0x3fb   :  { %792 = vst.msk [vmem:[%s1442_s15] sm:$0x3] %vm791_vm4, %v790_v5 }
 0x3fc   :  { %1021 = dma.done.wait [#allocation4], 32  }
 0x3fd   :  { %1022 = vsyncadd [#allocation4], 4294967264 }
 0x3fe   :  { %810 = vsyncpa [#allocation4], 1 }

// kernel: source_net_forward.2
= control target key start
LH: loop header
LB: loop body
LE: loop exit
PB: predicated region body
PF: predicated region fallthrough
CT: control target
= control target key end

     0   :  { %s1446_s12 = smov 0   ;;  %s1448_s13 = smov 0   ;;  %s1741_s0 = inlined_call_operand.vmem [shape: f32[2,8,18,32], index: 0, kind: input, shape index: {}]   ;;  %s1742_s1 = inlined_call_operand.vmem [shape: f32[2,3,32,128], index: 1, kind: input, shape index: {}]   ;;  %s1743_s2 = inlined_call_operand.vmem [shape: f32[2,1,128], index: 2, kind: input, shape index: {}]   ;;  %s1744_s3 = inlined_call_operand.vmem [shape: f32[2,8,128], index: 3, kind: output, shape index: {}]  }
   0x1   :  { %s1450_s14 = smov 0  }
   0x2 LB: > { %s25_s15 = sadd.s32 1, %s1420_s13  ;;  %p1149_p0 = scmp.ge.s32.totalorder %s1424_s14, 1  ;;  %s1424_s14 = sphi %s1450_s14, %s13_s14   ;;  %s1420_s13 = sphi %s1448_s13, %s1746_s13   ;;  %s1416_s12 = sphi %s1446_s12, %s1745_s12  }
   0x3   : > { %p27_p1 = scmp.ge.s32.totalorder %s25_s15, 2  ;;  %p177_p2 = scmp.lt.s32.totalorder %s1424_s14, 3 }
   0x5   : > { %s1748_s15 = smov (%p27_p1, %s25_s15), 0  ;;  %p178_p3 = pnand %p1149_p0, %p177_p2 }
   0x6   : > { %p217_p4 = scmp.lt.s32.totalorder (!%p178_p3), %s1416_s12, 1 }
   0x7   : > { %181 = sbr.rel (%p178_p3) target bundleno = 292 (0x124), region = 32 }
   0xc   : > { %s1750_s12 = smov (!%p217_p4, %s1416_s12), 1  ;;  %vm294_vm0 = vcmask 1046528   ;;  %vm340_vm1 = vcmask 261120   ;;  %vm695_vm2 = vcmask 1045504   ;;  %vm1022_vm3 = vcmask 1041409  }
   0xd   : > { %s1376_s16 = smul.u32 192, %s1750_s12  ;;  %s234_s26 = scalar_lea.vmem %s1743_s2, %s1750_s12  ;;  %vm1025_vm4 = vcmask 1042434   ;;  %vm1028_vm5 = vcmask 1043459   ;;  %vm1031_vm6 = vcmask 1044484   ;;  %vm1034_vm7 = vcmask 1045509  }
   0xe   : > { %s1377_s17 = smul.u32 96, %s1750_s12  ;;  %s1152_s27 = sshll.u32 %s1750_s12, 3  ;;  %vm1037_vm8 = vcmask 1046534   ;;  %vm1040_vm9 = vcmask 1047559  }
   0xf   : > { %s1471_s20 = scalar_lea.vmem %s1741_s0, %s1376_s16  ;;  %s241_s30 = scalar_lea.vmem %s1744_s3, %s1152_s27 }
  0x10   : > { %s1476_s23 = scalar_lea.vmem %s1742_s1, %s1377_s17  ;;  %v1479_v0 = vld [vmem:[%s1471_s20 + $0x60] sm:$0xff]  ;;  %v1482_v1 = vld [vmem:[%s1471_s20 + $0x68] sm:$0xff]  ;;  %v1495_v8 = vld [vmem:[%s1471_s20 + $0x70] sm:$0x3] }
  0x11   : > { %v1485_v2 = vld [vmem:[%s1471_s20] sm:$0xff]  ;;  %v1156_v3 = vld [vmem:[%s1476_s23 + $0x38] sm:$0xff]  ;;  %v1155_v4 = vld [vmem:[%s1476_s23 + $0x30] sm:$0xff]  ;;  %v315_v5 = vrot.slane %v1479_v0, 1  ;;  %v316_v6 = vrot.slane %v1482_v1, 1  ;;  %v318_v13 = vrot.slane %v1495_v8, 1 }
  0x12   : > { %1368 = vmatprep.subr.mxu1 %v1156_v3  ;;  %1272 = vmatprep.subr.mxu0 %v1156_v3  ;;  %v1492_v7 = vld [vmem:[%s1471_s20 + $0x8] sm:$0xff]  ;;  %v295_v10 = vrot.slane %v1485_v2, 1  ;;  %v1501_v12 = vld [vmem:[%s1471_s20 + $0x10] sm:$0x3]  ;;  %v1505_v14 = vld [vmem:[%s1471_s20 + $0x78] sm:$0xff] }
  0x13   : > { %1372 = vmatpush3.msra.mxu1 %v1156_v3  ;;  %1273 = vmatpush3.msra.mxu0 %v1156_v3  ;;  %v1154_v9 = vld [vmem:[%s1476_s23 + $0x28] sm:$0xff]  ;;  %v296_v11 = vrot.slane %v1492_v7, 1  ;;  %v1508_v15 = vld [vmem:[%s1471_s20 + $0x80] sm:$0xff]  ;;  %v1511_v16 = vld [vmem:[%s1471_s20 + $0x18] sm:$0xff]  ;;  %v298_v18 = vrot.slane %v1501_v12, 1  ;;  %v317_v21 = vsel %vm294_vm0, %v315_v5, %v316_v6  ;;  %v320_v22 = vrot.slane %v1505_v14, 1 }
  0x14   : > { %1369 = vmatprep.subr.mxu1 %v1155_v4  ;;  %1274 = vmatprep.subr.mxu0 %v1155_v4  ;;  %v1153_v17 = vld [vmem:[%s1476_s23 + $0x20] sm:$0xff]  ;;  %v1519_v20 = vld [vmem:[%s1471_s20 + $0x88] sm:$0x3]  ;;  %v321_v23 = vrot.slane %v1508_v15, 1  ;;  %v300_v26 = vrot.slane %v1511_v16, 1  ;;  %v1531_v28 = vld [vmem:[%s1471_s20 + $0x90] sm:$0xff]  ;;  %v319_v30 = vsel %vm294_vm0, %v316_v6, %v318_v13 }
  0x15   : > { %1373 = vmatpush3.msra.mxu1 %v1155_v4  ;;  %1275 = vmatpush3.msra.mxu0 %v1155_v4  ;;  %v1516_v19 = vld [vmem:[%s1471_s20 + $0x20] sm:$0xff]  ;;  %v1525_v24 = vld [vmem:[%s1471_s20 + $0x28] sm:$0x3]  ;;  %v297_v25 = vsel %vm294_vm0, %v295_v10, %v296_v11  ;;  %v1534_v29 = vld [vmem:[%s1471_s20 + $0x98] sm:$0xff]  ;;  %v323_v32 = vrot.slane %v1519_v20, 1  ;;  %v299_v35 = vsel %vm294_vm0, %v296_v11, %v298_v18  ;;  %v325_v40 = vrot.slane %v1531_v28, 1 }
  0x16   : > { %1370 = vmatprep.subr.mxu1 %v1154_v9  ;;  %1276 = vmatprep.subr.mxu0 %v1154_v9  ;;  %v301_v27 = vrot.slane %v1516_v19, 1  ;;  %v269_v31 = vld [vmem:[%s1476_s23 + $0x18] sm:$0xff]  ;;  %v1540_v33 = vld [vmem:[%s1471_s20 + $0x30] sm:$0xff]  ;;  %v303_v36 = vrot.slane %v1525_v24, 1  ;;  %v1549_v37 = vld [vmem:[%s1471_s20 + $0xa0] sm:$0x3]  ;;  %v322_v39 = vsel %vm294_vm0, %v320_v22, %v321_v23 }
  0x17   : > { %1374 = vmatpush3.msra.mxu1 %v1154_v9  ;;  %1277 = vmatpush3.msra.mxu0 %v1154_v9  ;;  %v1543_v34 = vld [vmem:[%s1471_s20 + $0x38] sm:$0xff]  ;;  %v326_v41 = vrot.slane %v1534_v29, 1  ;;  %v1557_v42 = vld [vmem:[%s1471_s20 + $0x40] sm:$0x3]  ;;  %v305_v44 = vrot.slane %v1540_v33, 1  ;;  %v1564_v46 = vld [vmem:[%s1471_s20 + $0xa8] sm:$0xff]  ;;  %v324_v48 = vsel %vm294_vm0, %v321_v23, %v323_v32 }
  0x18   : > { %1371 = vmatprep.subr.mxu1 %v1153_v17  ;;  %1278 = vmatprep.subr.mxu0 %v1153_v17  ;;  %v1192_v38 = vld [vmem:[%s1476_s23 + $0x58] sm:$0xff]  ;;  %v302_v43 = vsel %vm294_vm0, %v300_v26, %v301_v27  ;;  %v306_v45 = vrot.slane %v1543_v34, 1  ;;  %v1567_v47 = vld [vmem:[%s1471_s20 + $0xb0] sm:$0xff]  ;;  %v328_v50 = vrot.slane %v1549_v37, 1  ;;  %v1574_v51 = vld [vmem:[%s1471_s20 + $0x48] sm:$0xff]  ;;  %v304_v53 = vsel %vm294_vm0, %v301_v27, %v303_v36 }
  0x19   : > { %1375 = vmatpush3.msra.mxu1 %v1153_v17  ;;  %1292 = vmatprep.mubr.msk.f32.mxu1 %vm340_vm1, %v317_v21  ;;  %v268_v49 = vld [vmem:[%s1476_s23 + $0x10] sm:$0xff]  ;;  %v308_v54 = vrot.slane %v1557_v42, 1  ;;  %v1583_v55 = vld [vmem:[%s1471_s20 + $0xb8] sm:$0x3]  ;;  %v327_v57 = vsel %vm294_vm0, %v325_v40, %v326_v41  ;;  %v330_v58 = vrot.slane %v1564_v46, 1  ;;  %v331_v59 = vrot.slane %v1567_v47, 1 }
  0x1a   : > { %1279 = vmatpush3.msra.mxu0 %v1153_v17  ;;  %1280 = vmatprep.mubr.msk.f32.mxu0 %vm340_vm1, %v297_v25  ;;  %v1577_v52 = vld [vmem:[%s1471_s20 + $0x50] sm:$0xff]  ;;  %v1591_v60 = vld [vmem:[%s1471_s20 + $0x58] sm:$0x3]  ;;  %v307_v61 = vsel %vm294_vm0, %v305_v44, %v306_v45  ;;  %v310_v62 = vrot.slane %v1574_v51, 1  ;;  %v329_v3 = vsel %vm294_vm0, %v326_v41, %v328_v50  ;;  %v267_v4 = vld [vmem:[%s1476_s23 + $0x8] sm:$0xff]  ;;  %v333_v5 = vrot.slane %v1583_v55, 1 }
  0x1b   : > { %1293 = vmatmul.mubr.msk.f32.vlgmr.msra.gmra.mxu1 %vm340_vm1, %v319_v30  ;;  %1304 = vmatprep.subr.mxu1 %v269_v31  ;;  %v1191_v56 = vld [vmem:[%s1476_s23 + $0x50] sm:$0xff]  ;;  %v311_v63 = vrot.slane %v1577_v52, 1  ;;  %v309_v6 = vsel %vm294_vm0, %v306_v45, %v308_v54  ;;  %v313_v9 = vrot.slane %v1591_v60, 1  ;;  %v1190_v10 = vld [vmem:[%s1476_s23 + $0x48] sm:$0xff]  ;;  %v332_v11 = vsel %vm294_vm0, %v330_v58, %v331_v59  ;;  %v266_v22 = vld [vmem:[%s1476_s23] sm:$0xff] }
  0x1c   : > { %1281 = vmatmul.mubr.msk.f32.vlgmr.msra.gmra.mxu0 %vm340_vm1, %v299_v35  ;;  %1305 = vmatpush3.msra.mxu1 %v269_v31  ;;  %v696_v17 = vrot.slane %v1485_v2, 2  ;;  %v697_v18 = vrot.slane %v1492_v7, 2  ;;  %v334_v21 = vsel %vm294_vm0, %v331_v59, %v333_v5  ;;  %v699_v23 = vrot.slane %v1501_v12, 2  ;;  %v1189_v26 = vld [vmem:[%s1476_s23 + $0x40] sm:$0xff] }
  0x1d   : > { %1336 = vmatprep.subr.mxu0 %v1192_v38  ;;  %1295 = vmatprep.mubr.msk.f32.mxu1 %vm340_vm1, %v322_v39  ;;  %v312_v13 = vsel %vm294_vm0, %v310_v62, %v311_v63  ;;  %v314_v25 = vsel %vm294_vm0, %v311_v63, %v313_v9  ;;  %v701_v27 = vrot.slane %v1511_v16, 2  ;;  %v702_v30 = vrot.slane %v1516_v19, 2 }
  0x1e   : > { %1337 = vmatpush3.msra.mxu0 %v1192_v38  ;;  %1283 = vmatprep.mubr.msk.f32.mxu0 %vm340_vm1, %v302_v43  ;;  %v698_v31 = vsel %vm695_vm2, %v696_v17, %v697_v18  ;;  %v700_v12 = vsel %vm695_vm2, %v697_v18, %v699_v23  ;;  %v704_v32 = vrot.slane %v1525_v24, 2  ;;  %v706_v36 = vrot.slane %v1540_v33, 2 }
  0x1f   : > { %1296 = vmatmul.mubr.msk.f32.gmra.mxu1 %vm340_vm1, %v324_v48  ;;  %1306 = vmatprep.subr.mxu1 %v268_v49  ;;  %v703_v35 = vsel %vm695_vm2, %v701_v27, %v702_v30  ;;  %v707_v38 = vrot.slane %v1543_v34, 2  ;;  %v709_v24 = vrot.slane %v1557_v42, 2  ;;  %v711_v40 = vrot.slane %v1574_v51, 2 }
  0x20   : > { %1284 = vmatmul.mubr.msk.f32.gmra.mxu0 %vm340_vm1, %v304_v53  ;;  %1307 = vmatpush3.msra.mxu1 %v268_v49  ;;  %v712_v41 = vrot.slane %v1577_v52, 2  ;;  %v716_v43 = vrot.slane %v1479_v0, 2  ;;  %v717_v44 = vrot.slane %v1482_v1, 2  ;;  %v721_v48 = vrot.slane %v1505_v14, 2 }
  0x21   : > { %1338 = vmatprep.subr.mxu0 %v1191_v56  ;;  %1298 = vmatprep.mubr.msk.f32.mxu1 %vm340_vm1, %v327_v57  ;;  %v708_v39 = vsel %vm695_vm2, %v706_v36, %v707_v38  ;;  %v722_v49 = vrot.slane %v1508_v15, 2  ;;  %v727_v53 = vrot.slane %v1534_v29, 2  ;;  %v731_v54 = vrot.slane %v1564_v46, 2 }
  0x22   : > { %1339 = vmatpush3.msra.mxu0 %v1191_v56  ;;  %1286 = vmatprep.mubr.msk.f32.mxu0 %vm340_vm1, %v307_v61  ;;  %v713_v42 = vsel %vm695_vm2, %v711_v40, %v712_v41  ;;  %v718_v45 = vsel %vm695_vm2, %v716_v43, %v717_v44  ;;  %v732_v56 = vrot.slane %v1567_v47, 2 }
  0x23   : > { %1299 = vmatmul.mubr.msk.f32.gmra.mxu1 %vm340_vm1, %v329_v3  ;;  %1308 = vmatprep.subr.mxu1 %v267_v4  ;;  %v723_v50 = vsel %vm695_vm2, %v721_v48, %v722_v49 }
  0x24   : > { %1287 = vmatmul.mubr.msk.f32.gmra.mxu0 %vm340_vm1, %v309_v6  ;;  %1309 = vmatpush3.msra.mxu1 %v267_v4 }
  0x25   : > { %1340 = vmatprep.subr.mxu0 %v1190_v10  ;;  %1301 = vmatprep.mubr.msk.f32.mxu1 %vm340_vm1, %v332_v11 }
  0x26   : > { %1341 = vmatpush3.msra.mxu0 %v1190_v10  ;;  %1289 = vmatprep.mubr.msk.f32.mxu0 %vm340_vm1, %v312_v13 }
  0x27   : > { %1302 = vmatmul.mubr.msk.f32.gmra.mxu1 %vm340_vm1, %v334_v21  ;;  %1310 = vmatprep.subr.mxu1 %v266_v22 }
  0x28   : > { %1290 = vmatmul.mubr.msk.f32.gmra.mxu0 %vm340_vm1, %v314_v25  ;;  %1311 = vmatpush3.msra.mxu1 %v266_v22 }
  0x29   : > { %1342 = vmatprep.subr.mxu0 %v1189_v26  ;;  %1312 = vmatprep.mubr.msk.f32.mxu1 %vm340_vm1, %v1485_v2  ;;  %v705_v2 = vsel %vm695_vm2, %v702_v30, %v704_v32 }
  0x2a   : > { %1343 = vmatpush3.msra.mxu0 %v1189_v26  ;;  %1344 = vmatprep.mubr.msk.f32.mxu0 %vm340_vm1, %v698_v31 }
  0x2b   : > { %1313 = vmatmul.mubr.msk.f32.vlgmr.msra.gmra.mxu1 %vm340_vm1, %v1492_v7  ;;  %v710_v7 = vsel %vm695_vm2, %v707_v38, %v709_v24 }
  0x2c   : > { %1345 = vmatmul.mubr.msk.f32.vlgmr.msra.gmra.mxu0 %vm340_vm1, %v700_v12  ;;  %1315 = vmatprep.mubr.msk.f32.mxu1 %vm340_vm1, %v1511_v16  ;;  %v714_v16 = vrot.slane %v1591_v60, 2 }
  0x2d   : > { %1347 = vmatprep.mubr.msk.f32.mxu0 %vm340_vm1, %v703_v35 }
  0x2f   : > { %1316 = vmatmul.mubr.msk.f32.gmra.mxu1 %vm340_vm1, %v1516_v19  ;;  %v715_v19 = vsel %vm695_vm2, %v712_v41, %v714_v16 }
  0x30   : > { %1348 = vmatmul.mubr.msk.f32.gmra.mxu0 %vm340_vm1, %v705_v2  ;;  %1318 = vmatprep.mubr.msk.f32.mxu1 %vm340_vm1, %v1540_v33  ;;  %v719_v33 = vrot.slane %v1495_v8, 2  ;;  %v724_v8 = vrot.slane %v1519_v20, 2  ;;  %v729_v20 = vrot.slane %v1549_v37, 2  ;;  %v733_v37 = vsel %vm695_vm2, %v731_v54, %v732_v56 }
  0x31   : > { %1350 = vmatprep.mubr.msk.f32.mxu0 %vm340_vm1, %v708_v39 }
  0x33   : > { %1319 = vmatmul.mubr.msk.f32.gmra.mxu1 %vm340_vm1, %v1543_v34  ;;  %v720_v34 = vsel %vm695_vm2, %v717_v44, %v719_v33 }
  0x34   : > { %1351 = vmatmul.mubr.msk.f32.gmra.mxu0 %vm340_vm1, %v710_v7  ;;  %1321 = vmatprep.mubr.msk.f32.mxu1 %vm340_vm1, %v1574_v51  ;;  %v726_v51 = vrot.slane %v1531_v28, 2 }
  0x35   : > { %1353 = vmatprep.mubr.msk.f32.mxu0 %vm340_vm1, %v713_v42 }
  0x37   : > { %1322 = vmatmul.mubr.msk.f32.gmra.mxu1 %vm340_vm1, %v1577_v52  ;;  %v728_v52 = vsel %vm695_vm2, %v726_v51, %v727_v53 }
  0x38   : > { %1354 = vmatmul.mubr.msk.f32.gmra.mxu0 %vm340_vm1, %v715_v19  ;;  %1324 = vmatprep.mubr.msk.f32.mxu1 %vm340_vm1, %v1479_v0  ;;  %v725_v0 = vsel %vm695_vm2, %v722_v49, %v724_v8 }
  0x39   : > { %1356 = vmatprep.mubr.msk.f32.mxu0 %vm340_vm1, %v718_v45 }
  0x3b   : > { %1325 = vmatmul.mubr.msk.f32.gmra.mxu1 %vm340_vm1, %v1482_v1  ;;  %v730_v1 = vsel %vm695_vm2, %v727_v53, %v729_v20 }
  0x3c   : > { %1357 = vmatmul.mubr.msk.f32.gmra.mxu0 %vm340_vm1, %v720_v34  ;;  %1327 = vmatprep.mubr.msk.f32.mxu1 %vm340_vm1, %v1505_v14  ;;  %v734_v14 = vrot.slane %v1583_v55, 2 }
  0x3d   : > { %1359 = vmatprep.mubr.msk.f32.mxu0 %vm340_vm1, %v723_v50 }
  0x3f   : > { %1328 = vmatmul.mubr.msk.f32.gmra.mxu1 %vm340_vm1, %v1508_v15  ;;  %v735_v15 = vsel %vm695_vm2, %v732_v56, %v734_v14 }
  0x40   : > { %1360 = vmatmul.mubr.msk.f32.gmra.mxu0 %vm340_vm1, %v725_v0  ;;  %1330 = vmatprep.mubr.msk.f32.mxu1 %vm340_vm1, %v1531_v28 }
  0x41   : > { %1362 = vmatprep.mubr.msk.f32.mxu0 %vm340_vm1, %v728_v52 }
  0x43   : > { %1331 = vmatmul.mubr.msk.f32.gmra.mxu1 %vm340_vm1, %v1534_v29 }
  0x44   : > { %1363 = vmatmul.mubr.msk.f32.gmra.mxu0 %vm340_vm1, %v730_v1  ;;  %1333 = vmatprep.mubr.msk.f32.mxu1 %vm340_vm1, %v1564_v46 }
  0x45   : > { %1365 = vmatprep.mubr.msk.f32.mxu0 %vm340_vm1, %v733_v37 }
  0x47   : > { %1334 = vmatmul.mubr.msk.f32.gmra.mxu1 %vm340_vm1, %v1567_v47 }
  0x48   : > { %1366 = vmatmul.mubr.msk.f32.gmra.mxu0 %vm340_vm1, %v735_v15 }
  0xdb   : > { %v1294_v28 = vpop.f32.mrf.mxu1 }
  0xdc   : > { %v1282_v55 = vpop.f32.mrf.mxu0 }
  0xdd   : > { %v479_v57 = vpop.f32.mrf.mxu1 }
  0xde   : > { %v439_v58 = vpop.f32.mrf.mxu0 }
  0xdf   : > { %v1706_v59 = vpop.f32.mrf.mxu1 }
  0xe0   : > { %v1285_v29 = vpop.f32.mrf.mxu0 }
  0xe1   : > { %v1708_v60 = vpop.f32.mrf.mxu1 }
  0xe2   : > { %v449_v61 = vpop.f32.mrf.mxu0 }
  0xe3   : > { %v1710_v46 = vpop.f32.mrf.mxu1 }
  0xe4   : > { %v1288_v62 = vpop.f32.mrf.mxu0 }
  0xe5   : > { %v1712_v63 = vpop.f32.mrf.mxu1 }
  0xe6   : > { %v459_v3 = vpop.f32.mrf.mxu0 }
  0xe7   : > { %v1714_v4 = vpop.f32.mrf.mxu1 }
  0xe8   : > { %v1291_v47 = vpop.f32.mrf.mxu0 }
  0xe9   : > { %v1716_v5 = vpop.f32.mrf.mxu1 }
  0xea   : > { %v469_v6 = vpop.f32.mrf.mxu0 }
  0xeb   : > { %v1314_v9 = vpop.f32.mrf.mxu1 }
  0xec   : > { %v1346_v10 = vpop.f32.mrf.mxu0  ;;  %v622_v30 = vadd.f32 %v1314_v9, %v1282_v55 }
  0xed   : > { %v616_v11 = vpop.f32.mrf.mxu1 }
  0xee   : > { %v839_v13 = vpop.f32.mrf.mxu0  ;;  %v617_v23 = vadd.f32 %v616_v11, %v439_v58  ;;  %v919_v41 = vadd.f32 %v1346_v10, %v622_v30 }
  0xef   : > { %v1317_v17 = vpop.f32.mrf.mxu1 }
  0xf0   : > { %v632_v18 = vadd.f32 %v1317_v17, %v1285_v29  ;;  %v1349_v21 = vpop.f32.mrf.mxu0  ;;  %v918_v38 = vadd.f32 %v839_v13, %v617_v23 }
  0xf1   : > { %v626_v22 = vpop.f32.mrf.mxu1 }
  0xf2   : > { %v627_v25 = vadd.f32 %v626_v22, %v449_v61  ;;  %v849_v26 = vpop.f32.mrf.mxu0  ;;  %v921_v31 = vadd.f32 %v1349_v21, %v632_v18  ;;  %v934_v33 = vmax.f32 %v918_v38, %v919_v41 }
  0xf3   : > { %v1320_v27 = vpop.f32.mrf.mxu1 }
  0xf4   : > { %v920_v12 = vadd.f32 %v849_v26, %v627_v25  ;;  %v642_v32 = vadd.f32 %v1320_v27, %v1288_v62  ;;  %v1352_v35 = vpop.f32.mrf.mxu0  ;;  %v935_v54 = vrot.slane %v934_v33, 4 }
  0xf5   : > { %v636_v36 = vpop.f32.mrf.mxu1 }
  0xf6   : > { %v941_v2 = vmax.f32 %v920_v12, %v921_v31  ;;  %v637_v24 = vadd.f32 %v636_v36, %v459_v3  ;;  %v859_v39 = vpop.f32.mrf.mxu0  ;;  %v923_v16 = vadd.f32 %v1352_v35, %v642_v32 }
  0xf7   : > { %v1323_v40 = vpop.f32.mrf.mxu1 }
  0xf8   : > { %v942_v7 = vrot.slane %v941_v2, 4  ;;  %v922_v42 = vadd.f32 %v859_v39, %v637_v24  ;;  %v1355_v43 = vpop.f32.mrf.mxu0  ;;  %v652_v44 = vadd.f32 %v1323_v40, %v1291_v47 }
  0xf9   : > { %v646_v19 = vpop.f32.mrf.mxu1 }
  0xfa   : > { %v948_v45 = vmax.f32 %v922_v42, %v923_v16  ;;  %v869_v48 = vpop.f32.mrf.mxu0  ;;  %v647_v49 = vadd.f32 %v646_v19, %v469_v6  ;;  %v943_v8 = vmax.f32 %v941_v2, %v942_v7  ;;  %v925_v53 = vadd.f32 %v1355_v43, %v652_v44 }
  0xfb   : > { %v1326_v34 = vpop.f32.mrf.mxu1  ;;  %v936_v6 = vmax.f32 %v934_v33, %v935_v54 }
  0xfc   : > { %v949_v50 = vrot.slane %v948_v45, 4  ;;  %v1358_v51 = vpop.f32.mrf.mxu0  ;;  %v924_v0 = vadd.f32 %v869_v48, %v647_v49  ;;  %v662_v20 = vadd.f32 %v1326_v34, %v1294_v28  ;;  %v944_v55 = vrot.slane %v943_v8, 2 }
  0xfd   : > { %v656_v52 = vpop.f32.mrf.mxu1  ;;  %v937_v30 = vrot.slane %v936_v6, 2 }
  0xfe   : > { %v950_v56 = vmax.f32 %v948_v45, %v949_v50  ;;  %v879_v1 = vpop.f32.mrf.mxu0  ;;  %v955_v14 = vmax.f32 %v924_v0, %v925_v53  ;;  %v657_v37 = vadd.f32 %v656_v52, %v479_v57  ;;  %v927_v61 = vadd.f32 %v1358_v51, %v662_v20 }
  0xff   : > { %v1329_v15 = vpop.f32.mrf.mxu1  ;;  %v945_v18 = vmax.f32 %v943_v8, %v944_v55  ;;  %v938_v16 = vmax.f32 %v936_v6, %v937_v30 }
 0x100   : > { %v1361_v58 = vpop.f32.mrf.mxu0  ;;  %v956_v29 = vrot.slane %v955_v14, 4  ;;  %v926_v62 = vadd.f32 %v879_v1, %v657_v37  ;;  %v672_v3 = vadd.f32 %v1329_v15, %v1706_v59  ;;  %v951_v9 = vrot.slane %v950_v56, 2 }
 0x101   : > { %v666_v47 = vpop.f32.mrf.mxu1  ;;  %v939_v0 = vrot.slane %v938_v16, 1 }
 0x102   : > { %v889_v10 = vpop.f32.mrf.mxu0  ;;  %v957_v11 = vmax.f32 %v955_v14, %v956_v29  ;;  %v962_v28 = vmax.f32 %v926_v62, %v927_v61  ;;  %v667_v13 = vadd.f32 %v666_v47, %v1708_v60  ;;  %v929_v25 = vadd.f32 %v1361_v58, %v672_v3 }
 0x103   : > { %v1332_v17 = vpop.f32.mrf.mxu1  ;;  %v952_v59 = vmax.f32 %v950_v56, %v951_v9  ;;  %v946_v60 = vrot.slane %v945_v18, 1  ;;  %v1209_v56 = vld [vmem:[%s234_s26] ss:$0 sm:$0xff]  ;;  %v940_v29 = vmax.f32 %v938_v16, %v939_v0 }
 0x104   : > { %v682_v57 = vadd.f32 %v1332_v17, %v1710_v46  ;;  %v1364_v21 = vpop.f32.mrf.mxu0  ;;  %v958_v22 = vrot.slane %v957_v11, 2  ;;  %v963_v23 = vrot.slane %v962_v28, 4  ;;  %v928_v26 = vadd.f32 %v889_v10, %v667_v13 }
 0x105   : > { %v676_v27 = vpop.f32.mrf.mxu1  ;;  %v953_v42 = vrot.slane %v952_v59, 1  ;;  %v947_v45 = vmax.f32 %v945_v18, %v946_v60  ;;  %v997_v17 = vadd.f32 %v1209_v56, %v940_v29 }
 0x106   : > { %v677_v31 = vadd.f32 %v676_v27, %v1712_v63  ;;  %v899_v12 = vpop.f32.mrf.mxu0  ;;  %v959_v32 = vmax.f32 %v957_v11, %v958_v22  ;;  %v964_v35 = vmax.f32 %v962_v28, %v963_v23  ;;  %v969_v36 = vmax.f32 %v928_v26, %v929_v25 }
 0x107   : > { %v1335_v38 = vpop.f32.mrf.mxu1  ;;  %v931_v2 = vadd.f32 %v1364_v21, %v682_v57  ;;  %v954_v51 = vmax.f32 %v952_v59, %v953_v42  ;;  %v998_v14 = vadd.f32 %v1209_v56, %v947_v45  ;;  %v1005_v59 = vmax.f32 %v997_v17, 0.0 }
 0x108   : > { %v930_v24 = vadd.f32 %v899_v12, %v677_v31  ;;  %v1367_v46 = vpop.f32.mrf.mxu0  ;;  %v965_v39 = vrot.slane %v964_v35, 2  ;;  %v970_v40 = vrot.slane %v969_v36, 4  ;;  %v692_v41 = vadd.f32 %v1335_v38, %v1714_v4 }
 0x109   : > { %v686_v7 = vpop.f32.mrf.mxu1  ;;  %v960_v44 = vrot.slane %v959_v32, 1  ;;  %v999_v55 = vadd.f32 %v1209_v56, %v954_v51  ;;  %v1006_v9 = vmax.f32 %v998_v14, 0.0 }
 0x10a   : > { %v976_v43 = vmax.f32 %v930_v24, %v931_v2  ;;  %v966_v63 = vmax.f32 %v964_v35, %v965_v39  ;;  %v971_v19 = vmax.f32 %v969_v36, %v970_v40  ;;  %v687_v33 = vadd.f32 %v686_v7, %v1716_v5  ;;  %v909_v49 = vpop.f32.mrf.mxu0 }
 0x10b   : > { %v933_v50 = vadd.f32 %v1367_v46, %v692_v41  ;;  %v961_v20 = vmax.f32 %v959_v32, %v960_v44  ;;  %v1007_v28 = vmax.f32 %v999_v55, 0.0  ;;  %v1021_v23 = vrot.slane %v1006_v9, 7 }
 0x10c   : > { %v977_v48 = vrot.slane %v976_v43, 4  ;;  %v967_v34 = vrot.slane %v966_v63, 1  ;;  %v972_v8 = vrot.slane %v971_v19, 2  ;;  %v932_v4 = vadd.f32 %v909_v49, %v687_v33 }
 0x10d   : > { %v1000_v61 = vadd.f32 %v1209_v56, %v961_v20  ;;  %v1024_v27 = vrot.slane %v1007_v28, 6  ;;  %v1023_v35 = vsel %vm1022_vm3, %v1021_v23, %v1005_v59 }
 0x10e   : > { %v978_v53 = vmax.f32 %v976_v43, %v977_v48  ;;  %v973_v52 = vmax.f32 %v971_v19, %v972_v8  ;;  %v983_v54 = vmax.f32 %v932_v4, %v933_v50  ;;  %v968_v1 = vmax.f32 %v966_v63, %v967_v34 }
 0x10f   : > { %v1008_v18 = vmax.f32 %v1000_v61, 0.0  ;;  %v1026_v60 = vsel %vm1025_vm4, %v1024_v27, %v1023_v35 }
 0x110   : > { %v979_v5 = vrot.slane %v978_v53, 2  ;;  %v974_v37 = vrot.slane %v973_v52, 1  ;;  %v984_v15 = vrot.slane %v983_v54, 4  ;;  %v1001_v47 = vadd.f32 %v1209_v56, %v968_v1 }
 0x111   : > { %v1027_v31 = vrot.slane %v1008_v18, 5 }
 0x112   : > { %v980_v58 = vmax.f32 %v978_v53, %v979_v5  ;;  %v975_v62 = vmax.f32 %v973_v52, %v974_v37  ;;  %v985_v3 = vmax.f32 %v983_v54, %v984_v15  ;;  %v1009_v21 = vmax.f32 %v1001_v47, 0.0 }
 0x113   : > { %v1029_v24 = vsel %vm1028_vm5, %v1027_v31, %v1026_v60 }
 0x114   : > { %v981_v6 = vrot.slane %v980_v58, 1  ;;  %v1002_v10 = vadd.f32 %v1209_v56, %v975_v62  ;;  %v986_v11 = vrot.slane %v985_v3, 2  ;;  %v1030_v32 = vrot.slane %v1009_v21, 4 }
 0x116   : > { %v982_v13 = vmax.f32 %v980_v58, %v981_v6  ;;  %v987_v57 = vmax.f32 %v985_v3, %v986_v11  ;;  %v1010_v25 = vmax.f32 %v1002_v10, 0.0  ;;  %v1032_v39 = vsel %vm1031_vm6, %v1030_v32, %v1029_v24 }
 0x118   : > { %v1003_v22 = vadd.f32 %v1209_v56, %v982_v13  ;;  %v988_v26 = vrot.slane %v987_v57, 1  ;;  %v1033_v36 = vrot.slane %v1010_v25, 3 }
 0x11a   : > { %v1011_v30 = vmax.f32 %v1003_v22, 0.0  ;;  %v989_v12 = vmax.f32 %v987_v57, %v988_v26  ;;  %v1035_v40 = vsel %vm1034_vm7, %v1033_v36, %v1032_v39 }
 0x11c   : > { %v1004_v38 = vadd.f32 %v1209_v56, %v989_v12  ;;  %v1036_v2 = vrot.slane %v1011_v30, 2 }
 0x11e   : > { %v1012_v46 = vmax.f32 %v1004_v38, 0.0  ;;  %v1038_v7 = vsel %vm1037_vm8, %v1036_v2, %v1035_v40 }
 0x120   : > { %v1039_v41 = vrot.slane %v1012_v46, 1 }
 0x122   : > { %v1041_v16 = vsel %vm1040_vm9, %v1039_v41, %v1038_v7 }
 0x123   : > { %1043 = vst [vmem:[%s241_s30] sm:$0xff] %v1041_v16 }
 0x124 PF: > { %s13_s14 = sadd.s32 1, %s1424_s14   ;;  %s1745_s12 = smov %s1420_s13 }
 0x125   : > { %p10_p5 = scmp.ge.s32.totalorder %s13_s14, 4   ;;  %s1746_s13 = smov %s1748_s15 }
 0x127   :  { %12 = sbr.rel (!%p10_p5) target bundleno = 2 (0x2), region = 70 }

</bundles_post_ra>
